<compile_context>
chip_gen: v7x
topology: tpu7x:2x2x1
jax: 0.10.0
libtpu: 0.0.40
codegen_flags: <defaults>
</compile_context>

<pallas_src>
import math

import jax
import jax.numpy as jnp
from jax.experimental import pallas as pl
from jax.experimental.pallas import tpu as pltpu


def _round_up(x, m):
    return ((x + m - 1) // m) * m


def _vmem_capacity_bytes():
    try:
        return int(pltpu.get_tpu_info().vmem_capacity_bytes)
    except Exception:
        return 64 * 1024 * 1024  # conservative (v7x-sized) fallback


def _cout_tile(cout_pad):
    # v6e/v7x MXU result panel is 256 wide; on v5e (4x128^2) tn=256 only
    # doubles output/accumulator traffic, so keep 128 there.
    tn = 128
    if cout_pad % 256 == 0:
        try:
            kind = jax.devices()[0].device_kind.lower()
        except Exception:
            kind = ""
        if "v5" not in kind:
            tn = 256
    return min(tn, cout_pad)


def aspp_module_forward(x, conv_w, bn_gamma, bn_beta, bn_mean, bn_var,
                        padding, dilation, eps=1e-5):
    """_ASPPModule forward: relu(bn(atrous_conv(x))), eval-mode BN.

    x: (N, Cin, H, W) f32.  conv_w: (Cout, Cin, KH, KW) f32.
    Returns (N, Cout, Hout, Wout) f32 in NCHW, matching the PyTorch module.
    """
    N, Cin, H, W = x.shape
    Cout, _, KH, KW = conv_w.shape
    d = int(dilation)
    p = int(padding)

    Hout = H + 2 * p - d * (KH - 1)
    Wout = W + 2 * p - d * (KW - 1)
    assert Hout > 0 and Wout > 0, "padding/dilation give an empty output"
    Hp, Wp = H + 2 * p, W + 2 * p

    # --- glue: NHWC + spatial zero-pad; this is the ONLY activation tensor the
    # kernel reads from HBM (no 9x im2col materialization). ---
    x_pad = jnp.pad(jnp.transpose(x, (0, 2, 3, 1)),
                    ((0, 0), (p, p), (p, p), (0, 0))).astype(jnp.bfloat16)

    # --- glue: fold BN scale into the conv weights, keep BN bias for the
    # epilogue; weights laid out as (tap, Cin, Cout) to match in-kernel taps. ---
    scale = bn_gamma / jnp.sqrt(bn_var + eps)              # (Cout,)
    bias = bn_beta - bn_mean * scale                       # (Cout,)

    Cout_pad = _round_up(Cout, 128)
    tn = _cout_tile(Cout_pad)
    num_j = Cout_pad // tn

    w = jnp.transpose(conv_w, (2, 3, 1, 0)).reshape(KH * KW, Cin, Cout)
    w = (w * scale[None, None, :]).astype(jnp.bfloat16)
    w = jnp.pad(w, ((0, 0), (0, 0), (0, Cout_pad - Cout)))        # (T, Cin, Cout_pad)
    bias2d = jnp.pad(bias[None, :], ((0, 0), (0, Cout_pad - Cout)))  # f32 (1, Cout_pad)

    def kernel(x_ref, w_ref, b_ref, o_ref):
        # x_ref: (1, Hp, Wp, Cin) bf16   w_ref: (KH*KW, Cin, tn) bf16
        # b_ref: (1, tn) f32             o_ref: (1, Hout, Wout, tn) f32
        acc = jnp.zeros((Hout * Wout, tn), jnp.float32)
        for t in range(KH * KW):            # static taps -> KH*KW MXU dots
            kh, kw = divmod(t, KW)
            win = x_ref[0, kh * d:kh * d + Hout, kw * d:kw * d + Wout, :]
            acc = acc + jnp.dot(win.reshape(Hout * Wout, Cin), w_ref[t],
                                preferred_element_type=jnp.float32)
        out = jnp.maximum(acc + b_ref[...], 0.0)          # bias + ReLU, f32
        o_ref[...] = out.reshape(1, Hout, Wout, tn).astype(o_ref.dtype)

    # --- VMEM budget: double-buffered ins/outs + in-kernel f32 accumulator. ---
    bytes_x = Hp * Wp * Cin * 2
    bytes_w = KH * KW * Cin * tn * 2
    bytes_o = Hout * Wout * tn * 4
    need = 2 * (bytes_x + bytes_w + tn * 4 + bytes_o) + bytes_o + bytes_x
    vmem_cap = _vmem_capacity_bytes()
    vmem_limit = int(min(max(2 * need, 24 * 1024 * 1024), int(0.75 * vmem_cap)))

    cost = pl.CostEstimate(
        flops=2 * N * Hout * Wout * KH * KW * Cin * Cout_pad,
        transcendentals=0,
        bytes_accessed=(N * bytes_x + KH * KW * Cin * Cout_pad * 2
                        + Cout_pad * 4 + N * Hout * Wout * Cout_pad * 4),
    )

    out_nhwc = pl.pallas_call(
        kernel,
        out_shape=jax.ShapeDtypeStruct((N, Hout, Wout, Cout_pad), jnp.float32),
        grid_spec=pltpu.PrefetchScalarGridSpec(
            num_scalar_prefetch=0,
            # j outermost so each weight slab is DMA'd once per Cout tile and
            # stays VMEM-resident across the inner batch axis.
            grid=(num_j, N),
            in_specs=[
                pl.BlockSpec((1, Hp, Wp, Cin), lambda j, n: (n, 0, 0, 0)),
                pl.BlockSpec((KH * KW, Cin, tn), lambda j, n: (0, 0, j)),
                pl.BlockSpec((1, tn), lambda j, n: (0, j)),
            ],
            out_specs=pl.BlockSpec((1, Hout, Wout, tn),
                                   lambda j, n: (n, 0, 0, j)),
        ),
        compiler_params=pltpu.CompilerParams(
            dimension_semantics=("parallel", "parallel"),
            vmem_limit_bytes=vmem_limit,
        ),
        cost_estimate=cost,
    )(x_pad, w, bias2d)

    # glue: drop Cout padding, NHWC -> NCHW to match the PyTorch module.
    # (Output kept f32 for parity; emit bf16 here if the consumer tolerates it.)
    return jnp.transpose(out_nhwc[..., :Cout], (0, 3, 1, 2))


def make_params(key, inplanes, planes, kernel_size):
    # kaiming_normal_ (fan_in, gain=sqrt(2)) on the conv weight; BN: gamma=1, beta=0.
    fan_in = inplanes * kernel_size * kernel_size
    std = math.sqrt(2.0 / fan_in)
    conv_w = jax.random.normal(
        key, (planes, inplanes, kernel_size, kernel_size), jnp.float32) * std
    bn_gamma = jnp.ones((planes,), jnp.float32)
    bn_beta = jnp.zeros((planes,), jnp.float32)
    bn_mean = jnp.zeros((planes,), jnp.float32)
    bn_var = jnp.ones((planes,), jnp.float32)
    return conv_w, bn_gamma, bn_beta, bn_mean, bn_var


if __name__ == "__main__":
    # small shapes consistent with the module: batch=2, inplanes=4, planes=8,
    # spatial 16x16, kernel_size=3, dilation=2, padding=2 (typical ASPP branch)
    N, Cin, H, W = 2, 4, 16, 16
    Cout, ksize, dilation, padding = 8, 3, 2, 2

    key = jax.random.PRNGKey(0)
    kx, kw_key = jax.random.split(key)
    x = jax.random.normal(kx, (N, Cin, H, W), jnp.float32)
    conv_w, g, b, m, v = make_params(kw_key, Cin, Cout, ksize)

    out = aspp_module_forward(x, conv_w, g, b, m, v, padding, dilation)
    out = jax.block_until_ready(out)

    # sanity check against a pure-JAX f32 reference of the same forward pass
    ref_conv = jax.lax.conv_general_dilated(
        x, conv_w, window_strides=(1, 1),
        padding=((padding, padding), (padding, padding)),
        rhs_dilation=(dilation, dilation),
        dimension_numbers=("NCHW", "OIHW", "NCHW"))
    scale = g / jnp.sqrt(v + 1e-5)
    ref = jnp.maximum(ref_conv * scale[None, :, None, None]
                      + (b - m * scale)[None, :, None, None], 0.0)
    assert out.shape == ref.shape
    # bf16 MXU operands (f32 accumulation) -> slightly looser tolerance vs f32 ref.
    assert jnp.allclose(out, ref, atol=5e-2, rtol=5e-2)

    print("KERNEL_OK")
</pallas_src>

<mosaic_0001>
module attributes {stable_mosaic.version = 11 : i64} {
  func.func @kernel(%arg0: i32, %arg1: i32, %arg2: memref<1x20x20x4xbf16, #tpu.memory_space<vmem>>, %arg3: memref<9x4x128xbf16, #tpu.memory_space<vmem>>, %arg4: memref<1x128xf32, #tpu.memory_space<vmem>>, %arg5: memref<1x16x16x128xf32, #tpu.memory_space<vmem>>) attributes {dimension_semantics = [#tpu.dimension_semantics<parallel>, #tpu.dimension_semantics<parallel>], iteration_bounds = array<i64: 1, 2>, scalar_prefetch = 0 : i64, scratch_operands = 0 : i64, tpu.core_type = #tpu.core_type<tc>, window_params = [{transform_indices = @transform_0, window_bounds = array<i64: 1, 20, 20, 4>}, {transform_indices = @transform_1, window_bounds = array<i64: 9, 4, 128>}, {transform_indices = @transform_2, window_bounds = array<i64: 1, 128>}, {transform_indices = @transform_3, window_bounds = array<i64: 1, 16, 16, 128>}]} {
    %cst = arith.constant 0.000000e+00 : f32
    %0 = vector.broadcast %cst : f32 to vector<256x128xf32>
    %c0 = arith.constant 0 : index
    %c0_0 = arith.constant 0 : index
    %c0_1 = arith.constant 0 : index
    %c0_2 = arith.constant 0 : index
    %1 = vector.load %arg2[%c0, %c0_0, %c0_1, %c0_2] : memref<1x20x20x4xbf16, #tpu.memory_space<vmem>>, vector<1x16x16x4xbf16>
    %2 = vector.shape_cast %1 : vector<1x16x16x4xbf16> to vector<16x16x4xbf16>
    %3 = vector.shape_cast %2 : vector<16x16x4xbf16> to vector<256x4xbf16>
    %c0_3 = arith.constant 0 : index
    %c0_4 = arith.constant 0 : index
    %c0_5 = arith.constant 0 : index
    %4 = vector.load %arg3[%c0_3, %c0_4, %c0_5] : memref<9x4x128xbf16, #tpu.memory_space<vmem>>, vector<1x4x128xbf16>
    %5 = vector.shape_cast %4 : vector<1x4x128xbf16> to vector<4x128xbf16>
    %cst_6 = arith.constant dense<0.000000e+00> : vector<256x128xf32>
    %6 = tpu.matmul %3, %5, %cst_6 {dimension_numbers = #tpu.dot_dimension_numbers<[1], [0], [0], [1], [0, 0, 1, 1], [], []>} : vector<256x4xbf16>, vector<4x128xbf16>, vector<256x128xf32> -> vector<256x128xf32>
    %7 = arith.addf %0, %6 : vector<256x128xf32>
    %c0_7 = arith.constant 0 : index
    %c0_8 = arith.constant 0 : index
    %c2 = arith.constant 2 : index
    %c0_9 = arith.constant 0 : index
    %8 = vector.load %arg2[%c0_7, %c0_8, %c2, %c0_9] : memref<1x20x20x4xbf16, #tpu.memory_space<vmem>>, vector<1x16x16x4xbf16>
    %9 = vector.shape_cast %8 : vector<1x16x16x4xbf16> to vector<16x16x4xbf16>
    %10 = vector.shape_cast %9 : vector<16x16x4xbf16> to vector<256x4xbf16>
    %c1 = arith.constant 1 : index
    %c0_10 = arith.constant 0 : index
    %c0_11 = arith.constant 0 : index
    %11 = vector.load %arg3[%c1, %c0_10, %c0_11] : memref<9x4x128xbf16, #tpu.memory_space<vmem>>, vector<1x4x128xbf16>
    %12 = vector.shape_cast %11 : vector<1x4x128xbf16> to vector<4x128xbf16>
    %cst_12 = arith.constant dense<0.000000e+00> : vector<256x128xf32>
    %13 = tpu.matmul %10, %12, %cst_12 {dimension_numbers = #tpu.dot_dimension_numbers<[1], [0], [0], [1], [0, 0, 1, 1], [], []>} : vector<256x4xbf16>, vector<4x128xbf16>, vector<256x128xf32> -> vector<256x128xf32>
    %14 = arith.addf %7, %13 : vector<256x128xf32>
    %c0_13 = arith.constant 0 : index
    %c0_14 = arith.constant 0 : index
    %c4 = arith.constant 4 : index
    %c0_15 = arith.constant 0 : index
    %15 = vector.load %arg2[%c0_13, %c0_14, %c4, %c0_15] : memref<1x20x20x4xbf16, #tpu.memory_space<vmem>>, vector<1x16x16x4xbf16>
    %16 = vector.shape_cast %15 : vector<1x16x16x4xbf16> to vector<16x16x4xbf16>
    %17 = vector.shape_cast %16 : vector<16x16x4xbf16> to vector<256x4xbf16>
    %c2_16 = arith.constant 2 : index
    %c0_17 = arith.constant 0 : index
    %c0_18 = arith.constant 0 : index
    %18 = vector.load %arg3[%c2_16, %c0_17, %c0_18] : memref<9x4x128xbf16, #tpu.memory_space<vmem>>, vector<1x4x128xbf16>
    %19 = vector.shape_cast %18 : vector<1x4x128xbf16> to vector<4x128xbf16>
    %cst_19 = arith.constant dense<0.000000e+00> : vector<256x128xf32>
    %20 = tpu.matmul %17, %19, %cst_19 {dimension_numbers = #tpu.dot_dimension_numbers<[1], [0], [0], [1], [0, 0, 1, 1], [], []>} : vector<256x4xbf16>, vector<4x128xbf16>, vector<256x128xf32> -> vector<256x128xf32>
    %21 = arith.addf %14, %20 : vector<256x128xf32>
    %c0_20 = arith.constant 0 : index
    %c2_21 = arith.constant 2 : index
    %c0_22 = arith.constant 0 : index
    %c0_23 = arith.constant 0 : index
    %22 = vector.load %arg2[%c0_20, %c2_21, %c0_22, %c0_23] : memref<1x20x20x4xbf16, #tpu.memory_space<vmem>>, vector<1x16x16x4xbf16>
    %23 = vector.shape_cast %22 : vector<1x16x16x4xbf16> to vector<16x16x4xbf16>
    %24 = vector.shape_cast %23 : vector<16x16x4xbf16> to vector<256x4xbf16>
    %c3 = arith.constant 3 : index
    %c0_24 = arith.constant 0 : index
    %c0_25 = arith.constant 0 : index
    %25 = vector.load %arg3[%c3, %c0_24, %c0_25] : memref<9x4x128xbf16, #tpu.memory_space<vmem>>, vector<1x4x128xbf16>
    %26 = vector.shape_cast %25 : vector<1x4x128xbf16> to vector<4x128xbf16>
    %cst_26 = arith.constant dense<0.000000e+00> : vector<256x128xf32>
    %27 = tpu.matmul %24, %26, %cst_26 {dimension_numbers = #tpu.dot_dimension_numbers<[1], [0], [0], [1], [0, 0, 1, 1], [], []>} : vector<256x4xbf16>, vector<4x128xbf16>, vector<256x128xf32> -> vector<256x128xf32>
    %28 = arith.addf %21, %27 : vector<256x128xf32>
    %c0_27 = arith.constant 0 : index
    %c2_28 = arith.constant 2 : index
    %c2_29 = arith.constant 2 : index
    %c0_30 = arith.constant 0 : index
    %29 = vector.load %arg2[%c0_27, %c2_28, %c2_29, %c0_30] : memref<1x20x20x4xbf16, #tpu.memory_space<vmem>>, vector<1x16x16x4xbf16>
    %30 = vector.shape_cast %29 : vector<1x16x16x4xbf16> to vector<16x16x4xbf16>
    %31 = vector.shape_cast %30 : vector<16x16x4xbf16> to vector<256x4xbf16>
    %c4_31 = arith.constant 4 : index
    %c0_32 = arith.constant 0 : index
    %c0_33 = arith.constant 0 : index
    %32 = vector.load %arg3[%c4_31, %c0_32, %c0_33] : memref<9x4x128xbf16, #tpu.memory_space<vmem>>, vector<1x4x128xbf16>
    %33 = vector.shape_cast %32 : vector<1x4x128xbf16> to vector<4x128xbf16>
    %cst_34 = arith.constant dense<0.000000e+00> : vector<256x128xf32>
    %34 = tpu.matmul %31, %33, %cst_34 {dimension_numbers = #tpu.dot_dimension_numbers<[1], [0], [0], [1], [0, 0, 1, 1], [], []>} : vector<256x4xbf16>, vector<4x128xbf16>, vector<256x128xf32> -> vector<256x128xf32>
    %35 = arith.addf %28, %34 : vector<256x128xf32>
    %c0_35 = arith.constant 0 : index
    %c2_36 = arith.constant 2 : index
    %c4_37 = arith.constant 4 : index
    %c0_38 = arith.constant 0 : index
    %36 = vector.load %arg2[%c0_35, %c2_36, %c4_37, %c0_38] : memref<1x20x20x4xbf16, #tpu.memory_space<vmem>>, vector<1x16x16x4xbf16>
    %37 = vector.shape_cast %36 : vector<1x16x16x4xbf16> to vector<16x16x4xbf16>
    %38 = vector.shape_cast %37 : vector<16x16x4xbf16> to vector<256x4xbf16>
    %c5 = arith.constant 5 : index
    %c0_39 = arith.constant 0 : index
    %c0_40 = arith.constant 0 : index
    %39 = vector.load %arg3[%c5, %c0_39, %c0_40] : memref<9x4x128xbf16, #tpu.memory_space<vmem>>, vector<1x4x128xbf16>
    %40 = vector.shape_cast %39 : vector<1x4x128xbf16> to vector<4x128xbf16>
    %cst_41 = arith.constant dense<0.000000e+00> : vector<256x128xf32>
    %41 = tpu.matmul %38, %40, %cst_41 {dimension_numbers = #tpu.dot_dimension_numbers<[1], [0], [0], [1], [0, 0, 1, 1], [], []>} : vector<256x4xbf16>, vector<4x128xbf16>, vector<256x128xf32> -> vector<256x128xf32>
    %42 = arith.addf %35, %41 : vector<256x128xf32>
    %c0_42 = arith.constant 0 : index
    %c4_43 = arith.constant 4 : index
    %c0_44 = arith.constant 0 : index
    %c0_45 = arith.constant 0 : index
    %43 = vector.load %arg2[%c0_42, %c4_43, %c0_44, %c0_45] : memref<1x20x20x4xbf16, #tpu.memory_space<vmem>>, vector<1x16x16x4xbf16>
    %44 = vector.shape_cast %43 : vector<1x16x16x4xbf16> to vector<16x16x4xbf16>
    %45 = vector.shape_cast %44 : vector<16x16x4xbf16> to vector<256x4xbf16>
    %c6 = arith.constant 6 : index
    %c0_46 = arith.constant 0 : index
    %c0_47 = arith.constant 0 : index
    %46 = vector.load %arg3[%c6, %c0_46, %c0_47] : memref<9x4x128xbf16, #tpu.memory_space<vmem>>, vector<1x4x128xbf16>
    %47 = vector.shape_cast %46 : vector<1x4x128xbf16> to vector<4x128xbf16>
    %cst_48 = arith.constant dense<0.000000e+00> : vector<256x128xf32>
    %48 = tpu.matmul %45, %47, %cst_48 {dimension_numbers = #tpu.dot_dimension_numbers<[1], [0], [0], [1], [0, 0, 1, 1], [], []>} : vector<256x4xbf16>, vector<4x128xbf16>, vector<256x128xf32> -> vector<256x128xf32>
    %49 = arith.addf %42, %48 : vector<256x128xf32>
    %c0_49 = arith.constant 0 : index
    %c4_50 = arith.constant 4 : index
    %c2_51 = arith.constant 2 : index
    %c0_52 = arith.constant 0 : index
    %50 = vector.load %arg2[%c0_49, %c4_50, %c2_51, %c0_52] : memref<1x20x20x4xbf16, #tpu.memory_space<vmem>>, vector<1x16x16x4xbf16>
    %51 = vector.shape_cast %50 : vector<1x16x16x4xbf16> to vector<16x16x4xbf16>
    %52 = vector.shape_cast %51 : vector<16x16x4xbf16> to vector<256x4xbf16>
    %c7 = arith.constant 7 : index
    %c0_53 = arith.constant 0 : index
    %c0_54 = arith.constant 0 : index
    %53 = vector.load %arg3[%c7, %c0_53, %c0_54] : memref<9x4x128xbf16, #tpu.memory_space<vmem>>, vector<1x4x128xbf16>
    %54 = vector.shape_cast %53 : vector<1x4x128xbf16> to vector<4x128xbf16>
    %cst_55 = arith.constant dense<0.000000e+00> : vector<256x128xf32>
    %55 = tpu.matmul %52, %54, %cst_55 {dimension_numbers = #tpu.dot_dimension_numbers<[1], [0], [0], [1], [0, 0, 1, 1], [], []>} : vector<256x4xbf16>, vector<4x128xbf16>, vector<256x128xf32> -> vector<256x128xf32>
    %56 = arith.addf %49, %55 : vector<256x128xf32>
    %c0_56 = arith.constant 0 : index
    %c4_57 = arith.constant 4 : index
    %c4_58 = arith.constant 4 : index
    %c0_59 = arith.constant 0 : index
    %57 = vector.load %arg2[%c0_56, %c4_57, %c4_58, %c0_59] : memref<1x20x20x4xbf16, #tpu.memory_space<vmem>>, vector<1x16x16x4xbf16>
    %58 = vector.shape_cast %57 : vector<1x16x16x4xbf16> to vector<16x16x4xbf16>
    %59 = vector.shape_cast %58 : vector<16x16x4xbf16> to vector<256x4xbf16>
    %c8 = arith.constant 8 : index
    %c0_60 = arith.constant 0 : index
    %c0_61 = arith.constant 0 : index
    %60 = vector.load %arg3[%c8, %c0_60, %c0_61] : memref<9x4x128xbf16, #tpu.memory_space<vmem>>, vector<1x4x128xbf16>
    %61 = vector.shape_cast %60 : vector<1x4x128xbf16> to vector<4x128xbf16>
    %cst_62 = arith.constant dense<0.000000e+00> : vector<256x128xf32>
    %62 = tpu.matmul %59, %61, %cst_62 {dimension_numbers = #tpu.dot_dimension_numbers<[1], [0], [0], [1], [0, 0, 1, 1], [], []>} : vector<256x4xbf16>, vector<4x128xbf16>, vector<256x128xf32> -> vector<256x128xf32>
    %63 = arith.addf %56, %62 : vector<256x128xf32>
    %c0_63 = arith.constant 0 : index
    %c0_64 = arith.constant 0 : index
    %64 = vector.load %arg4[%c0_63, %c0_64] : memref<1x128xf32, #tpu.memory_space<vmem>>, vector<1x128xf32>
    %65 = vector.broadcast %64 : vector<1x128xf32> to vector<256x128xf32>
    %66 = arith.addf %63, %65 : vector<256x128xf32>
    %cst_65 = arith.constant 0.000000e+00 : f32
    %67 = vector.broadcast %cst_65 : f32 to vector<256x128xf32>
    %68 = arith.maximumf %66, %67 : vector<256x128xf32>
    %69 = vector.shape_cast %68 : vector<256x128xf32> to vector<1x16x16x128xf32>
    %c0_66 = arith.constant 0 : index
    %c0_67 = arith.constant 0 : index
    %c0_68 = arith.constant 0 : index
    %c0_69 = arith.constant 0 : index
    %70 = vector.load %arg5[%c0_66, %c0_67, %c0_68, %c0_69] : memref<1x16x16x128xf32, #tpu.memory_space<vmem>>, vector<1x16x16x128xf32>
    tpu.vector_store %arg5[%c0_66, %c0_67, %c0_68, %c0_69], %69 {strides = array<i32>} : memref<1x16x16x128xf32, #tpu.memory_space<vmem>>, vector<1x16x16x128xf32>,
    return
  }
  func.func @transform_0(%arg0: i32, %arg1: i32) -> (i32, i32, i32, i32) {
    %c0_i32 = arith.constant 0 : i32
    %c0_i32_0 = arith.constant 0 : i32
    %c0_i32_1 = arith.constant 0 : i32
    %c0_i32_2 = arith.constant 0 : i32
    return %arg1, %c0_i32, %c0_i32_0, %c0_i32_1 : i32, i32, i32, i32
  }
  func.func @transform_1(%arg0: i32, %arg1: i32) -> (i32, i32, i32) {
    %c0_i32 = arith.constant 0 : i32
    %c0_i32_0 = arith.constant 0 : i32
    %c0_i32_1 = arith.constant 0 : i32
    return %c0_i32, %c0_i32_0, %arg0 : i32, i32, i32
  }
  func.func @transform_2(%arg0: i32, %arg1: i32) -> (i32, i32) {
    %c0_i32 = arith.constant 0 : i32
    %c0_i32_0 = arith.constant 0 : i32
    return %c0_i32, %arg0 : i32, i32
  }
  func.func @transform_3(%arg0: i32, %arg1: i32) -> (i32, i32, i32, i32) {
    %c0_i32 = arith.constant 0 : i32
    %c0_i32_0 = arith.constant 0 : i32
    %c0_i32_1 = arith.constant 0 : i32
    return %arg1, %c0_i32, %c0_i32_0, %arg0 : i32, i32, i32, i32
  }
}

</mosaic_0001>

<bundles_post_ra>
// kernel: tpu_custom_call.1
= control target key start
LH: loop header
LB: loop body
LE: loop exit
PB: predicated region body
PF: predicated region fallthrough
CT: control target
= control target key end

     0   :  { %8 = vsyncpa [#allocation3], 0  ;;  %s7221_s0 = inlined_call_operand.vmem [shape: bf16[2,20,20,4], index: 0, kind: input, shape index: {}]   ;;  %s7222_s1 = inlined_call_operand.vmem [shape: bf16[9,4,128], index: 1, kind: input, shape index: {}]   ;;  %s7223_s2 = inlined_call_operand.vmem [shape: f32[1,128], index: 2, kind: input, shape index: {}]   ;;  %s7224_s3 = inlined_call_operand.hbm [shape: f32[2,16,16,128], index: 3, kind: output, shape index: {}]  }
   0x1   :  { %10 = vsyncpa [#allocation3 + $0x1], 0  ;;  %s5916_s12 = smov 0   ;;  %s5918_s13 = smov 0  }
   0x2   :  { %s5920_s14 = smov 0   ;;  %s5922_s15 = smov 0  }
   0x3   :  { %s5924_s16 = smov 0   ;;  %s5926_s17 = smov 0  }
   0x4 LB: > { %s4335_s18 = sadd.s32 4294967295, %s5891_s17   ;;  %s4336_s19 = sadd.s32 4294967294, %s5891_s17   ;;  %s5891_s17 = sphi %s5926_s17, %s16_s17   ;;  %s5887_s16 = sphi %s5924_s16, %s7235_s16   ;;  %s5883_s15 = sphi %s5922_s15, %s7234_s15   ;;  %s5879_s14 = sphi %s5920_s14, %s7233_s14   ;;  %s5875_s13 = sphi %s5918_s13, %s7232_s13   ;;  %s5871_s12 = sphi %s5916_s12, %s7231_s12  }
   0x5   : > { %s25_s20 = sadd.s32 1, %s5887_s16  ;;  %s115_s21 = sadd.s32 1, %s5879_s14 }
   0x6   : > { %p26_p0 = scmp.ge.s32.totalorder %s25_s20, 2  ;;  %p125_p1 = scmp.ne.s32.totalorder %s5879_s14, %s5875_s13 }
   0x7   : > { %p126_p2 = scmp.eq.s32.totalorder %s4335_s18, 1  ;;  %p131_p3 = scmp.ne.s32.totalorder %s5875_s13, %s5871_s12 }
   0x8   : > { %s7237_s20 = smov (%p26_p0, %s25_s20), 0  ;;  %p132_p5 = scmp.eq.s32.totalorder %s4336_s19, 1 }
   0x9   : > { %p5956_p4 = por %p126_p2, %p125_p1  ;;  %s110_s23 = ssub.s32 %s5887_s16, %s7237_s20 }
   0xa   : > { %p4341_p6 = scmp.ge.s32.totalorder %s5891_s17, 1  ;;  %p113_p7 = scmp.eq.s32.totalorder %s110_s23, 0 }
   0xb   : > { %p5963_p8 = por %p132_p5, %p131_p3  ;;  %p171_p9 = scmp.lt.s32.totalorder %s5891_s17, 3 }
   0xc   : > { %s5969_s25 = scalar_select %p113_p7, %s5879_s14, %s115_s21  }
   0xd   : > { %p172_p10 = pnand %p4341_p6, %p171_p9 }
   0xe   : > { %v4360_v0 = vld [vmem:[%s7222_s1 + $0x2] sm:$0x3] (!%p172_p10)  ;;  %vm542_vm0 = vcmask (!%p172_p10), 1041408   ;;  %v4603_v1 = vld [vmem:[%s7222_s1 + $0x8] sm:$0x3] (!%p172_p10)  ;;  %p202_p11 = scmp.lt.s32.totalorder (!%p172_p10), %s5883_s15, 1 }
   0xf   : > { %175 = sbr.rel (%p172_p10) target bundleno = 557 (0x22d), region = 32  ;;  %5684 = vmatprep.subr.msk.bf16.mxu1 (!%p172_p10), %vm542_vm0, %v4360_v0  ;;  %5688 = vmatprep.subr.msk.bf16.mxu0 (!%p172_p10), %vm542_vm0, %v4603_v1  ;;  %v544_v2 = vsel (!%p172_p10), %vm542_vm0, %v4360_v0, 0  ;;  %v5981_v3 = vsel (!%p172_p10), %vm542_vm0, %v4603_v1, 0  ;;  %v247_v4 = vld [vmem:[%s7222_s1] sm:$0x3] (!%p172_p10)  ;;  %vm328_vm1 = vcmask (!%p172_p10), 1042432  }
  0x10   : > { %5121 = vmatpush3.bf16.msra.mxu1 (!%p172_p10), %v544_v2  ;;  %5257 = vmatpush3.bf16.msra.mxu0 (!%p172_p10), %v5981_v3  ;;  %v4684_v5 = vld [vmem:[%s7222_s1 + $0xa] sm:$0x3] (!%p172_p10)  ;;  %vm329_vm2 = vcmask (!%p172_p10), 1046532   ;;  %vm493_vm4 = vcmask (!%p172_p10), 31744   ;;  %v820_v35 = vsel (!%p172_p10), %vm542_vm0, %v247_v4, 0  ;;  %vm1048_vm5 = vcmask (!%p172_p10), 1045508  }
  0x11   : > { %5685 = vmatprep.subr.msk.bf16.mxu1 (!%p172_p10), %vm542_vm0, %v247_v4  ;;  %5690 = vmatprep.subr.msk.bf16.mxu0 (!%p172_p10), %vm542_vm0, %v4684_v5  ;;  %vm5999_vm3 = vmor (!%p172_p10), %vm328_vm1, %vm329_vm2  ;;  %v2592_v40 = vsel (!%p172_p10), %vm542_vm0, %v4684_v5, 0  ;;  %v6052_v49 = vld [vmem:[%s7222_s1 + $0x4] sm:$0x3] (!%p172_p10)  ;;  %s4966_s18 = sshll.u32 (!%p172_p10), %s5883_s15, 12  ;;  %s5893_s28 = smov (!%p172_p10), [#allocation2]  }
  0x12   : > { %vm6204_vm6 = vmor (!%p172_p10), %vm542_vm0, %vm1048_vm5  ;;  %s7166_s26 = scalar_lea.hbm (!%p172_p10), %s7224_s3, %s4966_s18  ;;  %s5817_s29 = sshll.u32 (!%p172_p10), %s5893_s28, 4  ;;  %s5818_s29 = int_to_ptr.vmem [resolvable:$false] %s5817_s29 }
  0x13   : > { %s5819_s30 = scalar_lea.vmem (!%p172_p10), %s5818_s29, 8192 }
  0x16   : > { %s203_s7 = scalar_select %p202_p11, %s5883_s15, 1 }
  0x18   : > { %s5694_s8 = smul.u32 240, %s203_s7  ;;  %s199_s7 = sand.u32 1, %s5875_s13  }
  0x19   : > { %s4342_s10 = sshll.u32 %s199_s7, 8  ;;  %s7175_s15 = scalar_lea.sflag [#allocation3], %s199_s7 }
  0x1a   : > { %s5997_s11 = scalar_lea.vmem %s7221_s0, %s5694_s8 }
  0x1b   : > { %v6004_v7 = vld [vmem:[%s5997_s11 + $0x4] sm:$0xf]  ;;  %v248_v8 = vld [vmem:[%s5997_s11] sm:$0xe]  ;;  %v249_v9 = vld [vmem:[%s5997_s11 + $0x8] sm:$0x1] }
  0x1c   : > { %v4344_v10 = vrot.slane %v248_v8, 9  ;;  %v333_v11 = vrot.slane %v6004_v7, 5  ;;  %v336_v12 = vrot.slane %v249_v9, 5  ;;  %v4539_v13 = vld [vmem:[%s5997_s11 + $0x18] sm:$0xe] }
  0x1d   : > { %v6011_v14 = vld [vmem:[%s5997_s11 + $0x1c] sm:$0xf]  ;;  %v4541_v15 = vld [vmem:[%s5997_s11 + $0x20] sm:$0x1]  ;;  %v4587_v16 = vrot.slane %v4539_v13, 9 }
  0x1e   : > { %v334_v17 = vsel %vm5999_vm3, %v4344_v10, %v333_v11  ;;  %v335_v18 = vrot.slane %v333_v11, 4  ;;  %v1913_v19 = vrot.slane %v6011_v14, 5  ;;  %v1916_v20 = vrot.slane %v4541_v15, 5  ;;  %v6018_v21 = vld [vmem:[%s5997_s11 + $0x10] sm:$0xf] }
  0x1f   : > { %v2383_v22 = vrot.slane %v6011_v14, 6  ;;  %v250_v23 = vld [vmem:[%s5997_s11 + $0xc] sm:$0xe]  ;;  %v251_v24 = vld [vmem:[%s5997_s11 + $0x14] sm:$0x1]  ;;  %v340_v25 = vrot.slane %v6018_v21, 5 }
  0x20   : > { %v337_v26 = vsel %vm5999_vm3, %v335_v18, %v336_v12  ;;  %v1914_v27 = vsel %vm5999_vm3, %v4587_v16, %v1913_v19  ;;  %v1915_v28 = vrot.slane %v1913_v19, 4  ;;  %v4345_v29 = vrot.slane %v250_v23, 9  ;;  %v4542_v30 = vld [vmem:[%s5997_s11 + $0x24] sm:$0xe]  ;;  %v6030_v31 = vld [vmem:[%s5997_s11 + $0x28] sm:$0xf] }
  0x21   : > { %v4361_v32 = vcombine.low %v334_v17, %v337_v26  ;;  %v342_v33 = vrot.slane %v340_v25, 4  ;;  %v343_v34 = vrot.slane %v251_v24, 5  ;;  %v4544_v36 = vld [vmem:[%s5997_s11 + $0x2c] sm:$0x1]  ;;  %v4588_v39 = vrot.slane %v4542_v30, 9 }
  0x22   : > { %v1917_v37 = vsel %vm5999_vm3, %v1915_v28, %v1916_v20  ;;  %v341_v38 = vsel %vm5999_vm3, %v4345_v29, %v340_v25  ;;  %v6040_v41 = vld [vmem:[%s5997_s11 + $0x1c] sm:$0xf]  ;;  %v252_v42 = vld [vmem:[%s5997_s11 + $0x18] sm:$0xe]  ;;  %v1920_v45 = vrot.slane %v6030_v31, 5  ;;  %v1923_v46 = vrot.slane %v4544_v36, 5 }
  0x23   : > { %5122 = vmatprep.mubr.msk.bf16.mxu1 %vm493_vm4, %v4361_v32  ;;  %v4604_v43 = vcombine.low %v1914_v27, %v1917_v37  ;;  %v344_v44 = vsel %vm5999_vm3, %v342_v33, %v343_v34  ;;  %v253_v47 = vld [vmem:[%s5997_s11 + $0x20] sm:$0x1]  ;;  %v4545_v48 = vld [vmem:[%s5997_s11 + $0x30] sm:$0xe]  ;;  %v6056_v50 = vrot.slane %v2383_v22, 4  ;;  %v2390_v52 = vrot.slane %v6030_v31, 6 }
  0x24   : > { %v4362_v51 = vcombine.low %v341_v38, %v344_v44  ;;  %v4346_v53 = vrot.slane %v252_v42, 9  ;;  %v6060_v54 = vld [vmem:[%s5997_s11 + $0x34] sm:$0xf]  ;;  %v1921_v55 = vsel %vm5999_vm3, %v4588_v39, %v1920_v45  ;;  %v1922_v56 = vrot.slane %v1920_v45, 4  ;;  %v4547_v59 = vld [vmem:[%s5997_s11 + $0x38] sm:$0x1] }
  0x25   : > { %5258 = vmatprep.mubr.msk.bf16.mxu0 %vm493_vm4, %v4604_v43  ;;  %v347_v57 = vrot.slane %v6040_v41, 5  ;;  %v350_v58 = vrot.slane %v253_v47, 5  ;;  %v6070_v60 = vrot.slane %v2390_v52, 4  ;;  %v4589_v61 = vrot.slane %v4545_v48, 9  ;;  %v6074_v0 = vld [vmem:[%s5997_s11 + $0x28] sm:$0xf] }
  0x26   : > { %5123 = vmatmul.mubr.msk.bf16.vlgmr.msra.gmra.mrb[0].mxu1 %vm493_vm4, %v4362_v51  ;;  %v1927_v62 = vrot.slane %v6060_v54, 5  ;;  %v1930_v63 = vrot.slane %v4547_v59, 5  ;;  %v1924_v1 = vsel %vm5999_vm3, %v1922_v56, %v1923_v46  ;;  %v254_v5 = vld [vmem:[%s5997_s11 + $0x24] sm:$0xe]  ;;  %v255_v8 = vld [vmem:[%s5997_s11 + $0x2c] sm:$0x1] }
  0x27   : > { %5155 = vmatpush3.bf16.msra.mxu1 %v820_v35  ;;  %v348_v2 = vsel %vm5999_vm3, %v4346_v53, %v347_v57  ;;  %v349_v4 = vrot.slane %v347_v57, 4  ;;  %v354_v9 = vrot.slane %v6074_v0, 5  ;;  %v6086_v10 = vld [vmem:[%s7222_s1 + $0xc] sm:$0x3]  ;;  %v4605_v11 = vcombine.low %v1921_v55, %v1924_v1  ;;  %v4548_v16 = vld [vmem:[%s5997_s11 + $0x3c] sm:$0xe] }
  0x28   : > { %v1928_v12 = vsel %vm5999_vm3, %v4589_v61, %v1927_v62  ;;  %v1929_v13 = vrot.slane %v1927_v62, 4  ;;  %v4347_v15 = vrot.slane %v254_v5, 9  ;;  %v6092_v17 = vld [vmem:[%s5997_s11 + $0x40] sm:$0xf]  ;;  %5686 = vmatprep.subr.msk.bf16.mxu1 %vm542_vm0, %v6052_v49  ;;  %v357_v20 = vrot.slane %v255_v8, 5 }
  0x29   : > { %v351_v18 = vsel %vm5999_vm3, %v349_v4, %v350_v58  ;;  %v356_v19 = vrot.slane %v354_v9, 4  ;;  %v4550_v23 = vld [vmem:[%s5997_s11 + $0x44] sm:$0x1]  ;;  %v4590_v24 = vrot.slane %v4548_v16, 9  ;;  %5259 = vmatmul.mubr.msk.bf16.vlgmr.msra.gmra.mrb[0].mxu0 %vm493_vm4, %v4605_v11  ;;  %v1934_v28 = vrot.slane %v6092_v17, 5 }
  0x2a   : > { %v4363_v25 = vcombine.low %v348_v2, %v351_v18  ;;  %v1931_v26 = vsel %vm5999_vm3, %v1929_v13, %v1930_v63  ;;  %v355_v27 = vsel %vm5999_vm3, %v4347_v15, %v354_v9  ;;  %v6106_v29 = vld [vmem:[%s5997_s11 + $0x34] sm:$0xf]  ;;  %v256_v30 = vld [vmem:[%s5997_s11 + $0x30] sm:$0xe]  ;;  %5291 = vmatpush3.bf16.msra.mxu0 %v2592_v40  ;;  %v1937_v34 = vrot.slane %v4550_v23, 5 }
  0x2b   : > { %v4606_v32 = vcombine.low %v1928_v12, %v1931_v26  ;;  %v358_v33 = vsel %vm5999_vm3, %v356_v19, %v357_v20  ;;  %v257_v35 = vld [vmem:[%s5997_s11 + $0x38] sm:$0x1]  ;;  %v4348_v36 = vrot.slane %v256_v30, 9  ;;  %v4551_v37 = vld [vmem:[%s5997_s11 + $0x48] sm:$0xe]  ;;  %v1935_v39 = vsel %vm5999_vm3, %v4590_v24, %v1934_v28  ;;  %5691 = vmatprep.subr.msk.bf16.mxu0 %vm542_vm0, %v6086_v10 }
  0x2c   : > { %5126 = vmatprep.mubr.msk.bf16.mxu1 %vm493_vm4, %v4363_v25  ;;  %v4364_v38 = vcombine.low %v355_v27, %v358_v33  ;;  %v1936_v42 = vrot.slane %v1934_v28, 4  ;;  %v361_v40 = vrot.slane %v6106_v29, 5  ;;  %v6118_v43 = vld [vmem:[%s5997_s11 + $0x4c] sm:$0xf]  ;;  %v4553_v44 = vld [vmem:[%s5997_s11 + $0x50] sm:$0x1] }
  0x2d   : > { %5262 = vmatprep.mubr.msk.bf16.mxu0 %vm493_vm4, %v4606_v32  ;;  %v364_v45 = vrot.slane %v257_v35, 5  ;;  %v4591_v46 = vrot.slane %v4551_v37, 9  ;;  %v1941_v47 = vrot.slane %v6118_v43, 5  ;;  %v1944_v48 = vrot.slane %v4553_v44, 5  ;;  %v6126_v51 = vld [vmem:[%s5997_s11 + $0x40] sm:$0xf] }
  0x2e   : > { %5127 = vmatmul.mubr.msk.bf16.gmra.mrb[4].mxu1 %vm493_vm4, %v4364_v38  ;;  %v1938_v53 = vsel %vm5999_vm3, %v1936_v42, %v1937_v34  ;;  %v362_v55 = vsel %vm5999_vm3, %v4348_v36, %v361_v40  ;;  %v363_v56 = vrot.slane %v361_v40, 4  ;;  %v258_v57 = vld [vmem:[%s5997_s11 + $0x3c] sm:$0xe]  ;;  %v259_v58 = vld [vmem:[%s5997_s11 + $0x44] sm:$0x1]  ;;  %v368_v59 = vrot.slane %v6126_v51, 5 }
  0x2f   : > { %v4607_v61 = vcombine.low %v1935_v39, %v1938_v53  ;;  %v1942_v62 = vsel %vm5999_vm3, %v4591_v46, %v1941_v47  ;;  %v1943_v63 = vrot.slane %v1941_v47, 4  ;;  %v4349_v1 = vrot.slane %v258_v57, 9  ;;  %v4554_v2 = vld [vmem:[%s5997_s11 + $0x54] sm:$0xe]  ;;  %v6140_v4 = vld [vmem:[%s5997_s11 + $0x58] sm:$0xf] }
  0x30   : > { %v365_v5 = vsel %vm5999_vm3, %v363_v56, %v364_v45  ;;  %v370_v8 = vrot.slane %v368_v59, 4  ;;  %v371_v9 = vrot.slane %v259_v58, 5  ;;  %v4556_v11 = vld [vmem:[%s5997_s11 + $0x5c] sm:$0x1]  ;;  %v4592_v12 = vrot.slane %v4554_v2, 9 }
  0x31   : > { %v4365_v13 = vcombine.low %v362_v55, %v365_v5  ;;  %v1945_v15 = vsel %vm5999_vm3, %v1943_v63, %v1944_v48  ;;  %v369_v16 = vsel %vm5999_vm3, %v4349_v1, %v368_v59  ;;  %v1948_v18 = vrot.slane %v6140_v4, 5  ;;  %v6151_v19 = vld [vmem:[%s5997_s11 + $0x4c] sm:$0xf]  ;;  %v260_v20 = vld [vmem:[%s5997_s11 + $0x48] sm:$0xe]  ;;  %5263 = vmatmul.mubr.msk.bf16.gmra.mrb[4].mxu0 %vm493_vm4, %v4607_v61 }
  0x32   : > { %v4608_v23 = vcombine.low %v1942_v62, %v1945_v15  ;;  %v372_v24 = vsel %vm5999_vm3, %v370_v8, %v371_v9  ;;  %v1951_v25 = vrot.slane %v4556_v11, 5  ;;  %v261_v26 = vld [vmem:[%s5997_s11 + $0x50] sm:$0x1]  ;;  %v4350_v27 = vrot.slane %v260_v20, 9  ;;  %v4557_v28 = vld [vmem:[%s5997_s11 + $0x60] sm:$0xe] }
  0x33   : > { %5130 = vmatprep.mubr.msk.bf16.mxu1 %vm493_vm4, %v4365_v13  ;;  %v4366_v30 = vcombine.low %v369_v16, %v372_v24  ;;  %v1949_v32 = vsel %vm5999_vm3, %v4592_v12, %v1948_v18  ;;  %v1950_v33 = vrot.slane %v1948_v18, 4  ;;  %v375_v34 = vrot.slane %v6151_v19, 5  ;;  %v6164_v35 = vld [vmem:[%s5997_s11 + $0x64] sm:$0xf]  ;;  %v4559_v36 = vld [vmem:[%s5997_s11 + $0x68] sm:$0x1] }
  0x34   : > { %5266 = vmatprep.mubr.msk.bf16.mxu0 %vm493_vm4, %v4608_v23  ;;  %v378_v37 = vrot.slane %v261_v26, 5  ;;  %v4593_v38 = vrot.slane %v4557_v28, 9  ;;  %v1955_v39 = vrot.slane %v6164_v35, 5  ;;  %v1958_v42 = vrot.slane %v4559_v36, 5  ;;  %v6170_v40 = vld [vmem:[%s5997_s11 + $0x58] sm:$0xf] }
  0x35   : > { %v1952_v44 = vsel %vm5999_vm3, %v1950_v33, %v1951_v25  ;;  %v376_v45 = vsel %vm5999_vm3, %v4350_v27, %v375_v34  ;;  %v377_v46 = vrot.slane %v375_v34, 4  ;;  %v262_v47 = vld [vmem:[%s5997_s11 + $0x54] sm:$0xe]  ;;  %v263_v48 = vld [vmem:[%s5997_s11 + $0x5c] sm:$0x1]  ;;  %v382_v53 = vrot.slane %v6170_v40, 5 }
  0x36   : > { %5131 = vmatmul.mubr.msk.bf16.gmra.mrb[8].mxu1 %vm493_vm4, %v4366_v30  ;;  %v4609_v55 = vcombine.low %v1949_v32, %v1952_v44  ;;  %v1956_v56 = vsel %vm5999_vm3, %v4593_v38, %v1955_v39  ;;  %v1957_v57 = vrot.slane %v1955_v39, 4  ;;  %v4351_v58 = vrot.slane %v262_v47, 9  ;;  %v4560_v59 = vld [vmem:[%s5997_s11 + $0x6c] sm:$0xe]  ;;  %v6184_v61 = vld [vmem:[%s5997_s11 + $0x70] sm:$0xf] }
  0x37   : > { %v379_v62 = vsel %vm5999_vm3, %v377_v46, %v378_v37  ;;  %v384_v63 = vrot.slane %v382_v53, 4  ;;  %v385_v1 = vrot.slane %v263_v48, 5  ;;  %v4562_v2 = vld [vmem:[%s5997_s11 + $0x74] sm:$0x1]  ;;  %v4594_v5 = vrot.slane %v4560_v59, 9 }
  0x38   : > { %v4367_v8 = vcombine.low %v376_v45, %v379_v62  ;;  %v1959_v9 = vsel %vm5999_vm3, %v1957_v57, %v1958_v42  ;;  %v383_v11 = vsel %vm5999_vm3, %v4351_v58, %v382_v53  ;;  %v1962_v12 = vrot.slane %v6184_v61, 5  ;;  %v6195_v13 = vld [vmem:[%s5997_s11 + $0x64] sm:$0xf]  ;;  %v264_v15 = vld [vmem:[%s5997_s11 + $0x60] sm:$0xe] }
  0x39   : > { %v4610_v16 = vcombine.low %v1956_v56, %v1959_v9  ;;  %v386_v18 = vsel %vm5999_vm3, %v384_v63, %v385_v1  ;;  %v1965_v20 = vrot.slane %v4562_v2, 5  ;;  %v265_v23 = vld [vmem:[%s5997_s11 + $0x68] sm:$0x1]  ;;  %v4352_v24 = vrot.slane %v264_v15, 9  ;;  %v4636_v25 = vld [vmem:[%s5997_s11 + $0x18] sm:$0xc]  ;;  %5267 = vmatmul.mubr.msk.bf16.gmra.mrb[8].mxu0 %vm493_vm4, %v4609_v55 }
  0x3a   : > { %5134 = vmatprep.mubr.msk.bf16.mxu1 %vm493_vm4, %v4367_v8  ;;  %v4368_v27 = vcombine.low %v383_v11, %v386_v18  ;;  %v1963_v28 = vsel %vm5999_vm3, %v4594_v5, %v1962_v12  ;;  %v1964_v30 = vrot.slane %v1962_v12, 4  ;;  %v389_v32 = vrot.slane %v6195_v13, 5  ;;  %v4637_v33 = vld [vmem:[%s5997_s11 + $0x20] sm:$0x3]  ;;  %v6215_v34 = vld [vmem:[%s5997_s11 + $0x70] sm:$0xf] }
  0x3b   : > { %5270 = vmatprep.mubr.msk.bf16.mxu0 %vm493_vm4, %v4610_v16  ;;  %v392_v36 = vrot.slane %v265_v23, 5  ;;  %v4668_v37 = vrot.slane %v4636_v25, 10  ;;  %v2386_v38 = vrot.slane %v4637_v33, 6  ;;  %v266_v39 = vld [vmem:[%s5997_s11 + $0x6c] sm:$0xe]  ;;  %v396_v42 = vrot.slane %v6215_v34, 5 }
  0x3c   : > { %v1966_v44 = vsel %vm5999_vm3, %v1964_v30, %v1965_v20  ;;  %v390_v45 = vsel %vm5999_vm3, %v4352_v24, %v389_v32  ;;  %v391_v46 = vrot.slane %v389_v32, 4  ;;  %v267_v47 = vld [vmem:[%s5997_s11 + $0x74] sm:$0x1]  ;;  %v4353_v48 = vrot.slane %v266_v39, 9  ;;  %v4638_v53 = vld [vmem:[%s5997_s11 + $0x24] sm:$0xc] }
  0x3d   : > { %v4611_v55 = vcombine.low %v1963_v28, %v1966_v44  ;;  %v2384_v56 = vsel %vm6204_vm6, %v4668_v37, %v2383_v22  ;;  %v2387_v57 = vsel %vm6204_vm6, %v6056_v50, %v2386_v38  ;;  %v398_v58 = vrot.slane %v396_v42, 4  ;;  %v4639_v59 = vld [vmem:[%s5997_s11 + $0x2c] sm:$0x3]  ;;  %v6235_v62 = vld [vmem:[%s5997_s11 + $0x7c] sm:$0xf] }
  0x3e   : > { %5135 = vmatmul.mubr.msk.bf16.gmra.mrb[12].mxu1 %vm493_vm4, %v4368_v27  ;;  %v393_v63 = vsel %vm5999_vm3, %v391_v46, %v392_v36  ;;  %v4685_v1 = vcombine.low %v2384_v56, %v2387_v57  ;;  %v397_v14 = vsel %vm5999_vm3, %v4353_v48, %v396_v42  ;;  %v399_v22 = vrot.slane %v267_v47, 5  ;;  %v268_v2 = vld [vmem:[%s5997_s11 + $0x78] sm:$0xe]  ;;  %v269_v5 = vld [vmem:[%s5997_s11 + $0x80] sm:$0x1] }
  0x3f   : > { %v4369_v8 = vcombine.low %v390_v45, %v393_v63  ;;  %v4669_v50 = vrot.slane %v4638_v53, 10  ;;  %v2393_v9 = vrot.slane %v4639_v59, 6  ;;  %v4354_v11 = vrot.slane %v268_v2, 9  ;;  %v4640_v12 = vld [vmem:[%s5997_s11 + $0x30] sm:$0xc] }
  0x40   : > { %v400_v15 = vsel %vm5999_vm3, %v398_v58, %v399_v22  ;;  %v403_v16 = vrot.slane %v6235_v62, 5  ;;  %v406_v18 = vrot.slane %v269_v5, 5  ;;  %v4641_v20 = vld [vmem:[%s5997_s11 + $0x38] sm:$0x3]  ;;  %v4670_v23 = vrot.slane %v4640_v12, 10 }
  0x41   : > { %5138 = vmatprep.mubr.msk.bf16.mxu1 %vm493_vm4, %v4369_v8  ;;  %v4370_v24 = vcombine.low %v397_v14, %v400_v15  ;;  %v2391_v25 = vsel %vm6204_vm6, %v4669_v50, %v2390_v52  ;;  %v2951_v27 = vsel %vm542_vm0, %v6086_v10, 0  ;;  %v2397_v28 = vrot.slane %v6060_v54, 6  ;;  %v6258_v30 = vld [vmem:[%s5997_s11 + $0x88] sm:$0xf]  ;;  %v270_v32 = vld [vmem:[%s5997_s11 + $0x84] sm:$0xe]  ;;  %5271 = vmatmul.mubr.msk.bf16.gmra.mrb[12].mxu0 %vm493_vm4, %v4611_v55 }
  0x42   : > { %v2394_v33 = vsel %vm6204_vm6, %v6070_v60, %v2393_v9  ;;  %v404_v31 = vsel %vm5999_vm3, %v4354_v11, %v403_v16  ;;  %v405_v52 = vrot.slane %v403_v16, 4  ;;  %v2400_v36 = vrot.slane %v4641_v20, 6  ;;  %v271_v37 = vld [vmem:[%s5997_s11 + $0x8c] sm:$0x1]  ;;  %v4642_v10 = vld [vmem:[%s5997_s11 + $0x3c] sm:$0xc]  ;;  %5292 = vmatprep.mubr.msk.bf16.mxu0 %vm493_vm4, %v4685_v1 }
  0x43   : > { %v2398_v54 = vsel %vm6204_vm6, %v4670_v23, %v2397_v28  ;;  %v2399_v38 = vrot.slane %v2397_v28, 4  ;;  %v4355_v39 = vrot.slane %v270_v32, 9  ;;  %v410_v42 = vrot.slane %v6258_v30, 5  ;;  %v4643_v60 = vld [vmem:[%s5997_s11 + $0x44] sm:$0x3] }
  0x44   : > { %v407_v44 = vsel %vm5999_vm3, %v405_v52, %v406_v18  ;;  %v413_v45 = vrot.slane %v271_v37, 5  ;;  %v4671_v46 = vrot.slane %v4642_v10, 10  ;;  %v2404_v47 = vrot.slane %v6092_v17, 6  ;;  %v6278_v48 = vld [vmem:[%s5997_s11 + $0x94] sm:$0xf] }
  0x45   : > { %v4686_v53 = vcombine.low %v2391_v25, %v2394_v33  ;;  %v4371_v55 = vcombine.low %v404_v31, %v407_v44  ;;  %v2401_v56 = vsel %vm6204_vm6, %v2399_v38, %v2400_v36  ;;  %v412_v57 = vrot.slane %v410_v42, 4  ;;  %v272_v58 = vld [vmem:[%s5997_s11 + $0x90] sm:$0xe]  ;;  %v273_v59 = vld [vmem:[%s5997_s11 + $0x98] sm:$0x1] }
  0x46   : > { %5139 = vmatmul.mubr.msk.bf16.gmra.mrb[16].mxu1 %vm493_vm4, %v4370_v24  ;;  %v4687_v63 = vcombine.low %v2398_v54, %v2401_v56  ;;  %v411_v1 = vsel %vm5999_vm3, %v4355_v39, %v410_v42  ;;  %v2406_v17 = vrot.slane %v2404_v47, 4  ;;  %v2407_v14 = vrot.slane %v4643_v60, 6  ;;  %v4644_v22 = vld [vmem:[%s5997_s11 + $0x48] sm:$0xc]  ;;  %v4645_v2 = vld [vmem:[%s5997_s11 + $0x50] sm:$0x3] }
  0x47   : > { %5142 = vmatprep.mubr.msk.bf16.mxu1 %vm493_vm4, %v4371_v55  ;;  %v414_v5 = vsel %vm5999_vm3, %v412_v57, %v413_v45  ;;  %v4356_v8 = vrot.slane %v272_v58, 9  ;;  %v417_v50 = vrot.slane %v6278_v48, 5  ;;  %v420_v9 = vrot.slane %v273_v59, 5  ;;  %v6294_v11 = vld [vmem:[%s5997_s11 + $0xa0] sm:$0xf] }
  0x48   : > { %v2405_v12 = vsel %vm6204_vm6, %v4671_v46, %v2404_v47  ;;  %v4672_v15 = vrot.slane %v4644_v22, 10  ;;  %v2411_v16 = vrot.slane %v6118_v43, 6  ;;  %v274_v18 = vld [vmem:[%s5997_s11 + $0x9c] sm:$0xe]  ;;  %v275_v20 = vld [vmem:[%s5997_s11 + $0xa4] sm:$0x1]  ;;  %v4372_v23 = vcombine.low %v411_v1, %v414_v5 }
  0x49   : > { %v418_v24 = vsel %vm5999_vm3, %v4356_v8, %v417_v50  ;;  %v419_v25 = vrot.slane %v417_v50, 4  ;;  %v2414_v28 = vrot.slane %v4645_v2, 6  ;;  %v4646_v32 = vld [vmem:[%s5997_s11 + $0x54] sm:$0xc]  ;;  %v6307_v33 = vld [vmem:[%s7222_s1 + $0xe] sm:$0x3]  ;;  %5293 = vmatmul.mubr.msk.bf16.vlgmr.msra.gmra.mrb[0].mxu0 %vm493_vm4, %v4686_v53  ;;  %v2408_v43 = vsel %vm6204_vm6, %v2406_v17, %v2407_v14 }
  0x4a   : > { %v2413_v31 = vrot.slane %v2411_v16, 4  ;;  %v4357_v52 = vrot.slane %v274_v18, 9  ;;  %v424_v36 = vrot.slane %v6294_v11, 5  ;;  %v4647_v37 = vld [vmem:[%s5997_s11 + $0x5c] sm:$0x3]  ;;  %5325 = vmatpush3.bf16.msra.mxu0 %v2951_v27  ;;  %5296 = vmatprep.mubr.msk.bf16.mxu0 %vm493_vm4, %v4687_v63  ;;  %v427_v54 = vrot.slane %v275_v20, 5 }
  0x4b   : > { %v421_v10 = vsel %vm5999_vm3, %v419_v25, %v420_v9  ;;  %v2418_v38 = vrot.slane %v6140_v4, 6  ;;  %v6319_v39 = vld [vmem:[%s5997_s11 + $0xac] sm:$0xf]  ;;  %v276_v42 = vld [vmem:[%s5997_s11 + $0xa8] sm:$0xe]  ;;  %v2412_v44 = vsel %vm6204_vm6, %v4672_v15, %v2411_v16  ;;  %5692 = vmatprep.subr.msk.bf16.mxu0 %vm542_vm0, %v6307_v33  ;;  %v4688_v47 = vcombine.low %v2405_v12, %v2408_v43 }
  0x4c   : > { %v4373_v60 = vcombine.low %v418_v24, %v421_v10  ;;  %v2415_v27 = vsel %vm6204_vm6, %v2413_v31, %v2414_v28  ;;  %v426_v45 = vrot.slane %v424_v36, 4  ;;  %v277_v46 = vld [vmem:[%s5997_s11 + $0xb0] sm:$0x1]  ;;  %v4673_v53 = vrot.slane %v4646_v32, 10  ;;  %v4648_v55 = vld [vmem:[%s5997_s11 + $0x60] sm:$0xc] }
  0x4d   : > { %v2420_v4 = vrot.slane %v2418_v38, 4  ;;  %v4649_v56 = vld [vmem:[%s5997_s11 + $0x68] sm:$0x3]  ;;  %v2421_v57 = vrot.slane %v4647_v37, 6  ;;  %v4358_v58 = vrot.slane %v276_v42, 9  ;;  %v431_v59 = vrot.slane %v6319_v39, 5 }
  0x4e   : > { %5143 = vmatmul.mubr.msk.bf16.gmra.mrb[20].mxu1 %vm493_vm4, %v4372_v23  ;;  %v434_v63 = vrot.slane %v277_v46, 5  ;;  %v6334_v1 = vld [vmem:[%s5997_s11 + $0xb8] sm:$0xf]  ;;  %v4689_v17 = vcombine.low %v2412_v44, %v2415_v27  ;;  %v425_v14 = vsel %vm5999_vm3, %v4357_v52, %v424_v36  ;;  %v428_v22 = vsel %vm5999_vm3, %v426_v45, %v427_v54  ;;  %v278_v5 = vld [vmem:[%s5997_s11 + $0xb4] sm:$0xe] }
  0x4f   : > { %5146 = vmatprep.mubr.msk.bf16.mxu1 %vm493_vm4, %v4373_v60  ;;  %v2425_v2 = vrot.slane %v6164_v35, 6  ;;  %v432_v8 = vsel %vm5999_vm3, %v4358_v58, %v431_v59  ;;  %v433_v50 = vrot.slane %v431_v59, 4  ;;  %v4674_v9 = vrot.slane %v4648_v55, 10  ;;  %v279_v15 = vld [vmem:[%s5997_s11 + $0xbc] sm:$0x1] }
  0x50   : > { %v2428_v12 = vrot.slane %v4649_v56, 6  ;;  %v2419_v16 = vsel %vm6204_vm6, %v4673_v53, %v2418_v38  ;;  %v438_v20 = vrot.slane %v6334_v1, 5  ;;  %v4374_v35 = vcombine.low %v425_v14, %v428_v22  ;;  %v4564_v28 = vld [vmem:[%s5997_s11 + $0x7c] sm:$0xf]  ;;  %v4650_v52 = vld [vmem:[%s5997_s11 + $0x6c] sm:$0xc] }
  0x51   : > { %v2427_v18 = vrot.slane %v2425_v2, 4  ;;  %5297 = vmatmul.mubr.msk.bf16.gmra.mrb[4].mxu0 %vm493_vm4, %v4688_v47  ;;  %v2422_v23 = vsel %vm6204_vm6, %v2420_v4, %v2421_v57  ;;  %v435_v24 = vsel %vm5999_vm3, %v433_v50, %v434_v63  ;;  %v4359_v25 = vrot.slane %v278_v5, 9  ;;  %v4651_v54 = vld [vmem:[%s5997_s11 + $0x74] sm:$0x3]  ;;  %v4652_v38 = vld [vmem:[%s5997_s11 + $0x78] sm:$0xc] }
  0x52   : > { %5300 = vmatprep.mubr.msk.bf16.mxu0 %vm493_vm4, %v4689_v17  ;;  %v4375_v32 = vcombine.low %v432_v8, %v435_v24  ;;  %v440_v43 = vrot.slane %v438_v20, 4  ;;  %v441_v31 = vrot.slane %v279_v15, 5  ;;  %v2432_v36 = vrot.slane %v6184_v61, 6  ;;  %v4653_v42 = vld [vmem:[%s5997_s11 + $0x80] sm:$0x3] }
  0x53   : > { %v2426_v37 = vsel %vm6204_vm6, %v4674_v9, %v2425_v2  ;;  %v2429_v10 = vsel %vm6204_vm6, %v2427_v18, %v2428_v12  ;;  %v2439_v60 = vrot.slane %v4564_v28, 6  ;;  %v4690_v44 = vcombine.low %v2419_v16, %v2422_v23  ;;  %v215_v4 = vld [vmem:[%s5997_s11] sm:$0xf]  ;;  %v4567_v58 = vld [vmem:[%s5997_s11 + $0x88] sm:$0xf] }
  0x54   : > { %v439_v27 = vsel %vm5999_vm3, %v4359_v25, %v438_v20  ;;  %v4675_v61 = vrot.slane %v4650_v52, 10  ;;  %v4691_v45 = vcombine.low %v2426_v37, %v2429_v10  ;;  %v442_v46 = vsel %vm5999_vm3, %v440_v43, %v441_v31  ;;  %v4570_v59 = vld [vmem:[%s5997_s11 + $0x94] sm:$0xf]  ;;  %v4654_v50 = vld [vmem:[%s5997_s11 + $0x84] sm:$0xc] }
  0x55   : > { %v2434_v47 = vrot.slane %v2432_v36, 4  ;;  %v2435_v53 = vrot.slane %v4651_v54, 6  ;;  %v4676_v55 = vrot.slane %v4652_v38, 10  ;;  %v2441_v56 = vrot.slane %v2439_v60, 4  ;;  %v4655_v9 = vld [vmem:[%s5997_s11 + $0x8c] sm:$0x3] }
  0x56   : > { %5147 = vmatmul.mubr.msk.bf16.gmra.mrb[24].mxu1 %vm493_vm4, %v4374_v35  ;;  %v2442_v57 = vrot.slane %v4653_v42, 6  ;;  %v4376_v63 = vcombine.low %v439_v27, %v442_v46  ;;  %v2433_v17 = vsel %vm6204_vm6, %v4675_v61, %v2432_v36  ;;  %v4393_v22 = vcombine.low %v215_v4, %v6004_v7  ;;  %v4656_v15 = vld [vmem:[%s5997_s11 + $0x90] sm:$0xc]  ;;  %v4657_v16 = vld [vmem:[%s5997_s11 + $0x98] sm:$0x3] }
  0x57   : > { %5150 = vmatprep.mubr.msk.bf16.mxu1 %vm493_vm4, %v4375_v32  ;;  %v2436_v14 = vsel %vm6204_vm6, %v2434_v47, %v2435_v53  ;;  %v2446_v2 = vrot.slane %v4567_v58, 6  ;;  %v2440_v5 = vsel %vm6204_vm6, %v4676_v55, %v2439_v60  ;;  %v2453_v12 = vrot.slane %v4570_v59, 6  ;;  %v217_v7 = vld [vmem:[%s5997_s11 + $0xc] sm:$0xf]  ;;  %v219_v25 = vld [vmem:[%s5997_s11 + $0x18] sm:$0xf] }
  0x58   : > { %v2443_v8 = vsel %vm6204_vm6, %v2441_v56, %v2442_v57  ;;  %v4692_v18 = vcombine.low %v2433_v17, %v2436_v14  ;;  %v4677_v35 = vrot.slane %v4654_v50, 10  ;;  %v2449_v24 = vrot.slane %v4655_v9, 6  ;;  %v4573_v31 = vld [vmem:[%s5997_s11 + $0xa0] sm:$0xf]  ;;  %v4576_v52 = vld [vmem:[%s5997_s11 + $0xac] sm:$0xf] }
  0x59   : > { %5301 = vmatmul.mubr.msk.bf16.gmra.mrb[8].mxu0 %vm493_vm4, %v4690_v44  ;;  %v4693_v20 = vcombine.low %v2440_v5, %v2443_v8  ;;  %v2448_v23 = vrot.slane %v2446_v2, 4  ;;  %v4678_v28 = vrot.slane %v4656_v15, 10  ;;  %v2455_v32 = vrot.slane %v2453_v12, 4  ;;  %v4658_v37 = vld [vmem:[%s5997_s11 + $0x9c] sm:$0xc] }
  0x5a   : > { %5304 = vmatprep.mubr.msk.bf16.mxu0 %vm493_vm4, %v4691_v45  ;;  %v2456_v43 = vrot.slane %v4657_v16, 6  ;;  %v4394_v36 = vcombine.low %v217_v7, %v6018_v21  ;;  %v4659_v10 = vld [vmem:[%s5997_s11 + $0xa4] sm:$0x3]  ;;  %v2447_v54 = vsel %vm6204_vm6, %v4677_v35, %v2446_v2  ;;  %v4395_v42 = vcombine.low %v219_v25, %v6040_v41  ;;  %v4660_v61 = vld [vmem:[%s5997_s11 + $0xa8] sm:$0xc] }
  0x5b   : > { %v2450_v38 = vsel %vm6204_vm6, %v2448_v23, %v2449_v24  ;;  %v2460_v60 = vrot.slane %v4573_v31, 6  ;;  %v1261_v44 = vsel %vm542_vm0, %v6052_v49, 0  ;;  %v2454_v21 = vsel %vm6204_vm6, %v4678_v28, %v2453_v12  ;;  %v221_v46 = vld [vmem:[%s5997_s11 + $0x24] sm:$0xf]  ;;  %v4661_v47 = vld [vmem:[%s5997_s11 + $0xb0] sm:$0x3] }
  0x5c   : > { %v2457_v27 = vsel %vm6204_vm6, %v2455_v32, %v2456_v43  ;;  %v2467_v45 = vrot.slane %v4576_v52, 6  ;;  %v4694_v53 = vcombine.low %v2447_v54, %v2450_v38  ;;  %v4679_v41 = vrot.slane %v4658_v37, 10  ;;  %v223_v55 = vld [vmem:[%s5997_s11 + $0x30] sm:$0xf]  ;;  %v4579_v49 = vld [vmem:[%s5997_s11 + $0xb8] sm:$0xf] }
  0x5d   : > { %v2463_v4 = vrot.slane %v4659_v10, 6  ;;  %v4695_v56 = vcombine.low %v2454_v21, %v2457_v27  ;;  %v2462_v57 = vrot.slane %v2460_v60, 4  ;;  %v4680_v58 = vrot.slane %v4660_v61, 10  ;;  %v4662_v17 = vld [vmem:[%s5997_s11 + $0xb4] sm:$0xc] }
  0x5e   : > { %5151 = vmatmul.mubr.msk.bf16.gmra.mrb[28].mxu1 %vm493_vm4, %v4376_v63  ;;  %v2469_v59 = vrot.slane %v2467_v45, 4  ;;  %v2470_v63 = vrot.slane %v4661_v47, 6  ;;  %v4582_v14 = vld [vmem:[%s5997_s11 + $0xc4] sm:$0xf]  ;;  %v4663_v2 = vld [vmem:[%s5997_s11 + $0xbc] sm:$0x3]  ;;  %v2461_v5 = vsel %vm6204_vm6, %v4679_v41, %v2460_v60  ;;  %v4397_v50 = vcombine.low %v223_v55, %v6106_v29 }
  0x5f   : > { %5156 = vmatprep.mubr.msk.bf16.mxu1 %vm493_vm4, %v4393_v22  ;;  %v4396_v22 = vcombine.low %v221_v46, %v6074_v0  ;;  %v2464_v8 = vsel %vm6204_vm6, %v2462_v57, %v2463_v4  ;;  %v2474_v9 = vrot.slane %v4579_v49, 6  ;;  %v2468_v12 = vsel %vm6204_vm6, %v4680_v58, %v2467_v45  ;;  %v4664_v0 = vld [vmem:[%s5997_s11 + $0xc0] sm:$0xc]  ;;  %v225_v7 = vld [vmem:[%s5997_s11 + $0x3c] sm:$0xf] }
  0x60   : > { %v2471_v15 = vsel %vm6204_vm6, %v2469_v59, %v2470_v63  ;;  %v2481_v16 = vrot.slane %v4582_v14, 6  ;;  %v4696_v35 = vcombine.low %v2461_v5, %v2464_v8  ;;  %v4681_v23 = vrot.slane %v4662_v17, 10  ;;  %v227_v24 = vld [vmem:[%s5997_s11 + $0x48] sm:$0xf]  ;;  %v4666_v21 = vld [vmem:[%s5997_s11 + $0xcc] sm:$0xc] }
  0x61   : > { %5305 = vmatmul.mubr.msk.bf16.gmra.mrb[12].mxu0 %vm493_vm4, %v4692_v18  ;;  %v6437_v18 = vld [vmem:[%s7222_s1 + $0x6] sm:$0x3]  ;;  %v4697_v25 = vcombine.low %v2468_v12, %v2471_v15  ;;  %v2476_v28 = vrot.slane %v2474_v9, 4  ;;  %v2477_v32 = vrot.slane %v4663_v2, 6  ;;  %v4682_v43 = vrot.slane %v4664_v0, 10  ;;  %v5761_v59 = vld [vmem:[%s5997_s11 + $0x30] sm:$0xff]  }
  0x62   : > { %5308 = vmatprep.mubr.msk.bf16.mxu0 %vm493_vm4, %v4693_v20  ;;  %v4665_v20 = vld [vmem:[%s5997_s11 + $0xc8] sm:$0x3]  ;;  %v2483_v31 = vrot.slane %v2481_v16, 4  ;;  %v4398_v37 = vcombine.low %v225_v7, %v6126_v51  ;;  %v2475_v10 = vsel %vm6204_vm6, %v4681_v23, %v2474_v9  ;;  %v4399_v38 = vcombine.low %v227_v24, %v6151_v19  ;;  %v4667_v27 = vld [vmem:[%s5997_s11 + $0xd4] sm:$0x3]  ;;  %v5763_v2 = vld [vmem:[%s5997_s11 + $0x3c] sm:$0xff]  }
  0x63   : > { %v2484_v52 = vrot.slane %v4665_v20, 6  ;;  %v2478_v54 = vsel %vm6204_vm6, %v2476_v28, %v2477_v32  ;;  %v2482_v60 = vsel %vm6204_vm6, %v4682_v43, %v2481_v16  ;;  %v229_v45 = vld [vmem:[%s5997_s11 + $0x54] sm:$0xf]  ;;  %v4683_v47 = vrot.slane %v4666_v21, 10  ;;  %v231_v4 = vld [vmem:[%s5997_s11 + $0x60] sm:$0xf] }
  0x64   : > { %v4698_v61 = vcombine.low %v2475_v10, %v2478_v54  ;;  %v2491_v41 = vrot.slane %v4667_v27, 6  ;;  %v4400_v55 = vcombine.low %v229_v45, %v6170_v40  ;;  %v4401_v57 = vcombine.low %v231_v4, %v6195_v13  ;;  %v233_v63 = vld [vmem:[%s5997_s11 + $0x6c] sm:$0xf]  ;;  %v235_v17 = vld [vmem:[%s5997_s11 + $0x78] sm:$0xf]  ;;  %v5769_v16 = vld [vmem:[%s5997_s11 + $0x60] sm:$0xff]  }
  0x65   : > { %v4402_v14 = vcombine.low %v233_v63, %v6215_v34  ;;  %v5765_v5 = vld [vmem:[%s5997_s11 + $0x48] sm:$0xff]   ;;  %v237_v8 = vld [vmem:[%s5997_s11 + $0x84] sm:$0xf]  ;;  %v239_v9 = vld [vmem:[%s5997_s11 + $0x90] sm:$0xf] }
  0x66   : > { %5157 = vmatmul.mubr.msk.bf16.vlgmr.msra.gmra.mrb[0].mxu1 %vm493_vm4, %v4394_v36  ;;  %v4585_v36 = vld [vmem:[%s5997_s11 + $0xd0] sm:$0xf]  ;;  %v4404_v15 = vcombine.low %v237_v8, %v6258_v30  ;;  %v4405_v0 = vcombine.low %v239_v9, %v6278_v48  ;;  %v241_v7 = vld [vmem:[%s5997_s11 + $0x9c] sm:$0xf]  ;;  %v5800_v20 = vld [vmem:[%s5997_s11 + $0x4] sm:$0xf] }
  0x67   : > { %5189 = vmatpush3.bf16.msra.mxu1 %v1261_v44  ;;  %5160 = vmatprep.mubr.msk.bf16.mxu1 %vm493_vm4, %v4395_v42  ;;  %v2488_v42 = vrot.slane %v4585_v36, 6  ;;  %v2485_v44 = vsel %vm6204_vm6, %v2483_v31, %v2484_v52  ;;  %v6493_v12 = vld [vmem:[%s7222_s1 + $0x10] sm:$0x3]  ;;  %v243_v23 = vld [vmem:[%s5997_s11 + $0xa8] sm:$0xf]  ;;  %v4406_v28 = vcombine.low %v241_v7, %v6294_v11  ;;  %v5773_v54 = vld [vmem:[%s5997_s11 + $0x78] sm:$0xff]  }
  0x68   : > { %5687 = vmatprep.subr.msk.bf16.mxu1 %vm542_vm0, %v6437_v18  ;;  %v4699_v46 = vcombine.low %v2482_v60, %v2485_v44  ;;  %v983_v24 = vld [vmem:[%s5997_s11] sm:$0xc]  ;;  %v4407_v32 = vcombine.low %v243_v23, %v6319_v39  ;;  %v5801_v36 = vld [vmem:[%s5997_s11 + $0x10] sm:$0xf]  ;;  %v986_v60 = vld [vmem:[%s5997_s11 + $0x14] sm:$0x3] }
  0x69   : > { %5309 = vmatmul.mubr.msk.bf16.gmra.mrb[16].mxu0 %vm493_vm4, %v4694_v53  ;;  %v2490_v53 = vrot.slane %v2488_v42, 4  ;;  %v2489_v49 = vsel %vm6204_vm6, %v4683_v47, %v2488_v42  ;;  %v4425_v43 = vrot.slane %v983_v24, 10  ;;  %v5771_v10 = vld [vmem:[%s5997_s11 + $0x6c] sm:$0xff]   ;;  %v5802_v27 = vld [vmem:[%s5997_s11 + $0x1c] sm:$0xf]  ;;  %v1080_v9 = vrot.slane %v6106_v29, 6 }
  0x6a   : > { %5312 = vmatprep.mubr.msk.bf16.mxu0 %vm493_vm4, %v4695_v56  ;;  %v985_v42 = vld [vmem:[%s5997_s11 + $0xc] sm:$0xc]  ;;  %v987_v45 = vld [vmem:[%s5997_s11 + $0x18] sm:$0xc]  ;;  %v1620_v23 = vsel %vm542_vm0, %v6437_v18, 0  ;;  %v1087_v18 = vrot.slane %v6126_v51, 6 }
  0x6b   : > { %v2492_v56 = vsel %vm6204_vm6, %v2490_v53, %v2491_v41  ;;  %v4426_v4 = vrot.slane %v985_v42, 10  ;;  %v1082_v29 = vrot.slane %v1080_v9, 4  ;;  %v5804_v42 = vld [vmem:[%s7222_s1 + $0x8] sm:$0x3]  ;;  %v996_v51 = vld [vmem:[%s5997_s11 + $0x50] sm:$0x3] }
  0x6c   : > { %v4700_v58 = vcombine.low %v2489_v49, %v2492_v56  ;;  %v4427_v49 = vrot.slane %v987_v45, 10 }
  0x6e   : > { %5161 = vmatmul.mubr.msk.bf16.gmra.mrb[4].mxu1 %vm493_vm4, %v4396_v22  ;;  %v4403_v22 = vcombine.low %v235_v17, %v6235_v62 }
  0x6f   : > { %5164 = vmatprep.mubr.msk.bf16.mxu1 %vm493_vm4, %v4397_v50  ;;  %v3453_v50 = vsel %vm542_vm0, %v6307_v33, 0  ;;  %v5767_v33 = vld [vmem:[%s5997_s11 + $0x54] sm:$0xff]  }
  0x71   : > { %5313 = vmatmul.mubr.msk.bf16.gmra.mrb[20].mxu0 %vm493_vm4, %v4696_v35  ;;  %v1052_v35 = vrot.slane %v5800_v20, 6 }
  0x72   : > { %5316 = vmatprep.mubr.msk.bf16.mxu0 %vm493_vm4, %v4697_v25  ;;  %v984_v25 = vld [vmem:[%s5997_s11 + $0x8] sm:$0x3] }
  0x73   : > { %v1054_v31 = vrot.slane %v1052_v35, 4  ;;  %v1055_v52 = vrot.slane %v984_v25, 6  ;;  %v1053_v44 = vsel %vm6204_vm6, %v4425_v43, %v1052_v35  ;;  %v5778_v43 = vld [vmem:[%s5997_s11 + $0xa8] sm:$0xff]  }
  0x75   : > { %v1056_v21 = vsel %vm6204_vm6, %v1054_v31, %v1055_v52 }
  0x76   : > { %5165 = vmatmul.mubr.msk.bf16.gmra.mrb[8].mxu1 %vm493_vm4, %v4398_v37  ;;  %v1059_v37 = vrot.slane %v5801_v36, 6  ;;  %v4442_v41 = vcombine.low %v1053_v44, %v1056_v21 }
  0x77   : > { %5168 = vmatprep.mubr.msk.bf16.mxu1 %vm493_vm4, %v4399_v38  ;;  %v245_v38 = vld [vmem:[%s5997_s11 + $0xb4] sm:$0xf] }
  0x78   : > { %v1061_v47 = vrot.slane %v1059_v37, 4  ;;  %v4408_v53 = vcombine.low %v245_v38, %v6334_v1  ;;  %v1060_v63 = vsel %vm6204_vm6, %v4426_v4, %v1059_v37  ;;  %v1094_v38 = vrot.slane %v6151_v19, 6 }
  0x79   : > { %5317 = vmatmul.mubr.msk.bf16.gmra.mrb[24].mxu0 %vm493_vm4, %v4698_v61  ;;  %v1066_v61 = vrot.slane %v5802_v27, 6  ;;  %v1089_v27 = vrot.slane %v1087_v18, 4  ;;  %v1101_v4 = vrot.slane %v6170_v40, 6  ;;  %v1108_v40 = vrot.slane %v6195_v13, 6 }
  0x7a   : > { %5320 = vmatprep.mubr.msk.bf16.mxu0 %vm493_vm4, %v4699_v46  ;;  %v988_v46 = vld [vmem:[%s5997_s11 + $0x20] sm:$0x3]  ;;  %v1096_v45 = vrot.slane %v1094_v38, 4 }
  0x7b   : > { %v1068_v56 = vrot.slane %v1066_v61, 4  ;;  %v1067_v8 = vsel %vm6204_vm6, %v4427_v49, %v1066_v61  ;;  %v1110_v13 = vrot.slane %v1108_v40, 4 }
  0x7e   : > { %5169 = vmatmul.mubr.msk.bf16.gmra.mrb[12].mxu1 %vm493_vm4, %v4400_v55  ;;  %v1062_v55 = vrot.slane %v986_v60, 6 }
  0x7f   : > { %5172 = vmatprep.mubr.msk.bf16.mxu1 %vm493_vm4, %v4401_v57  ;;  %v1069_v57 = vrot.slane %v988_v46, 6  ;;  %v1097_v46 = vrot.slane %v996_v51, 6  ;;  %v4785_v51 = vld [vmem:[%s5997_s11 + $0x3c] sm:$0xe] }
  0x80   : > { %v1063_v17 = vsel %vm6204_vm6, %v1061_v47, %v1062_v55  ;;  %v5779_v47 = vld [vmem:[%s5997_s11 + $0xb4] sm:$0xff]  }
  0x81   : > { %5321 = vmatmul.mubr.msk.bf16.gmra.mrb[28].mxu0 %vm493_vm4, %v4700_v58  ;;  %v5775_v58 = vld [vmem:[%s5997_s11 + $0x84] sm:$0xff]  }
  0x82   : > { %5326 = vmatprep.mubr.msk.bf16.mxu0 %vm493_vm4, %v5761_v59  ;;  %v5776_v59 = vld [vmem:[%s5997_s11 + $0x90] sm:$0xff]  }
  0x86   : > { %5173 = vmatmul.mubr.msk.bf16.gmra.mrb[16].mxu1 %vm493_vm4, %v4402_v14  ;;  %v989_v14 = vld [vmem:[%s5997_s11 + $0x24] sm:$0xc] }
  0x87   : > { %5176 = vmatprep.mubr.msk.bf16.mxu1 %vm493_vm4, %v4403_v22  ;;  %v990_v22 = vld [vmem:[%s5997_s11 + $0x2c] sm:$0x3]  ;;  %v4428_v7 = vrot.slane %v989_v14, 10 }
  0x88   : > { %v1076_v35 = vrot.slane %v990_v22, 6 }
  0x89   : > { %5327 = vmatmul.mubr.msk.bf16.vlgmr.msra.gmra.mrb[0].mxu0 %vm493_vm4, %v5763_v2  ;;  %v5803_v2 = vld [vmem:[%s5997_s11 + $0x28] sm:$0xf] }
  0x8a   : > { %5359 = vmatpush3.bf16.msra.mxu0 %v3453_v50  ;;  %5330 = vmatprep.mubr.msk.bf16.mxu0 %vm493_vm4, %v5765_v5  ;;  %v1073_v5 = vrot.slane %v5803_v2, 6  ;;  %v1070_v50 = vsel %vm6204_vm6, %v1068_v56, %v1069_v57  ;;  %v998_v56 = vld [vmem:[%s5997_s11 + $0x5c] sm:$0x3]  ;;  %v1103_v2 = vrot.slane %v1101_v4, 4 }
  0x8b   : > { %5693 = vmatprep.subr.msk.bf16.mxu0 %vm542_vm0, %v6493_v12 }
  0x8c   : > { %v1075_v20 = vrot.slane %v1073_v5, 4  ;;  %v1074_v31 = vsel %vm6204_vm6, %v4428_v7, %v1073_v5  ;;  %v1104_v5 = vrot.slane %v998_v56, 6  ;;  %v1001_v7 = vld [vmem:[%s5997_s11 + $0x6c] sm:$0xc] }
  0x8e   : > { %5177 = vmatmul.mubr.msk.bf16.gmra.mrb[20].mxu1 %vm493_vm4, %v4404_v15  ;;  %v991_v15 = vld [vmem:[%s5997_s11 + $0x30] sm:$0xc]  ;;  %v1077_v52 = vsel %vm6204_vm6, %v1075_v20, %v1076_v35  ;;  %v5782_v20 = vld [vmem:[%s5997_s11 + $0xd8] sm:$0xff]  }
  0x8f   : > { %5180 = vmatprep.mubr.msk.bf16.mxu1 %vm493_vm4, %v4405_v0  ;;  %v992_v0 = vld [vmem:[%s5997_s11 + $0x38] sm:$0x3]  ;;  %v4429_v24 = vrot.slane %v991_v15, 10  ;;  %v4445_v60 = vcombine.low %v1074_v31, %v1077_v52  ;;  %v1122_v31 = vrot.slane %v6235_v62, 6 }
  0x90   : > { %v1083_v25 = vrot.slane %v992_v0, 6  ;;  %v4782_v0 = vld [vmem:[%s5997_s11 + $0x30] sm:$0xe] }
  0x91   : > { %5331 = vmatmul.mubr.msk.bf16.gmra.mrb[4].mxu0 %vm493_vm4, %v5767_v33  ;;  %v4443_v33 = vcombine.low %v1060_v63, %v1063_v17  ;;  %v1081_v36 = vsel %vm6204_vm6, %v4429_v24, %v1080_v9  ;;  %v6596_v63 = vld [vmem:[%s5997_s11 + $0x34] sm:$0xf]  ;;  %v1000_v17 = vld [vmem:[%s5997_s11 + $0x68] sm:$0x3]  ;;  %v1115_v24 = vrot.slane %v6215_v34, 6 }
  0x92   : > { %5334 = vmatprep.mubr.msk.bf16.mxu0 %vm493_vm4, %v5769_v16  ;;  %v4444_v16 = vcombine.low %v1067_v8, %v1070_v50  ;;  %v1084_v37 = vsel %vm6204_vm6, %v1082_v29, %v1083_v25  ;;  %v3244_v9 = vrot.slane %v6596_v63, 5  ;;  %v1111_v15 = vrot.slane %v1000_v17, 6  ;;  %v6614_v29 = vld [vmem:[%s5997_s11 + $0x40] sm:$0xf]  ;;  %v6624_v34 = vld [vmem:[%s5997_s11 + $0x4c] sm:$0xf] }
  0x93   : > { %v4446_v21 = vcombine.low %v1081_v36, %v1084_v37  ;;  %v4830_v25 = vrot.slane %v4782_v0, 9  ;;  %v4434_v36 = vrot.slane %v1001_v7, 10  ;;  %v3251_v37 = vrot.slane %v6614_v29, 5  ;;  %v1008_v7 = vld [vmem:[%s5997_s11 + $0x98] sm:$0x3] }
  0x95   : > { %v1116_v56 = vsel %vm6204_vm6, %v4434_v36, %v1115_v24  ;;  %v4794_v36 = vld [vmem:[%s5997_s11 + $0x60] sm:$0xe] }
  0x96   : > { %5181 = vmatmul.mubr.msk.bf16.gmra.mrb[24].mxu1 %vm493_vm4, %v4406_v28  ;;  %v5777_v28 = vld [vmem:[%s5997_s11 + $0x9c] sm:$0xff]  }
  0x97   : > { %5184 = vmatprep.mubr.msk.bf16.mxu1 %vm493_vm4, %v4407_v32  ;;  %v993_v32 = vld [vmem:[%s5997_s11 + $0x3c] sm:$0xc] }
  0x98   : > { %v4430_v44 = vrot.slane %v993_v32, 10 }
  0x99   : > { %5335 = vmatmul.mubr.msk.bf16.gmra.mrb[8].mxu0 %vm493_vm4, %v5771_v10  ;;  %v994_v10 = vld [vmem:[%s5997_s11 + $0x44] sm:$0x3] }
  0x9a   : > { %5338 = vmatprep.mubr.msk.bf16.mxu0 %vm493_vm4, %v5773_v54  ;;  %v995_v54 = vld [vmem:[%s5997_s11 + $0x48] sm:$0xc]  ;;  %v1090_v19 = vrot.slane %v994_v10, 6  ;;  %v1088_v55 = vsel %vm6204_vm6, %v4430_v44, %v1087_v18  ;;  %v1112_v18 = vsel %vm6204_vm6, %v1110_v13, %v1111_v15  ;;  %v1003_v10 = vld [vmem:[%s5997_s11 + $0x78] sm:$0xc]  ;;  %v1136_v13 = vrot.slane %v6278_v48, 6 }
  0x9b   : > { %v4431_v61 = vrot.slane %v995_v54, 10  ;;  %v1004_v54 = vld [vmem:[%s5997_s11 + $0x80] sm:$0x3] }
  0x9c   : > { %v1091_v49 = vsel %vm6204_vm6, %v1089_v27, %v1090_v19  ;;  %v4788_v27 = vld [vmem:[%s5997_s11 + $0x48] sm:$0xe]  ;;  %v3258_v19 = vrot.slane %v6624_v34, 5 }
  0x9d   : > { %v1095_v57 = vsel %vm6204_vm6, %v4431_v61, %v1094_v38  ;;  %v4447_v14 = vcombine.low %v1088_v55, %v1091_v49  ;;  %v5783_v49 = vld [vmem:[%s5997_s11 + $0xe4] sm:$0xff]  }
  0x9e   : > { %5185 = vmatmul.mubr.msk.bf16.gmra.mrb[28].mxu1 %vm493_vm4, %v4408_v53  ;;  %v5780_v53 = vld [vmem:[%s5997_s11 + $0xc0] sm:$0xff]  }
  0x9f   : > { %5190 = vmatprep.mubr.msk.bf16.mxu1 %vm493_vm4, %v4442_v41  ;;  %v997_v41 = vld [vmem:[%s5997_s11 + $0x54] sm:$0xc] }
  0xa0   : > { %v4432_v22 = vrot.slane %v997_v41, 10  ;;  %v4831_v41 = vrot.slane %v4785_v51, 9 }
  0xa1   : > { %5339 = vmatmul.mubr.msk.bf16.gmra.mrb[12].mxu0 %vm493_vm4, %v5775_v58  ;;  %v1098_v58 = vsel %vm6204_vm6, %v1096_v45, %v1097_v46  ;;  %v4435_v45 = vrot.slane %v1003_v10, 10  ;;  %v1124_v46 = vrot.slane %v1122_v31, 4 }
  0xa2   : > { %5342 = vmatprep.mubr.msk.bf16.mxu0 %vm493_vm4, %v5776_v59  ;;  %v999_v59 = vld [vmem:[%s5997_s11 + $0x60] sm:$0xc]  ;;  %v4448_v8 = vcombine.low %v1095_v57, %v1098_v58  ;;  %v1102_v35 = vsel %vm6204_vm6, %v4432_v22, %v1101_v4  ;;  %v3253_v4 = vrot.slane %v3251_v37, 4  ;;  %v4832_v58 = vrot.slane %v4788_v27, 9 }
  0xa3   : > { %v4433_v50 = vrot.slane %v999_v59, 10  ;;  %v1005_v59 = vld [vmem:[%s5997_s11 + $0x84] sm:$0xc]  ;;  %v3252_v0 = vsel %vm5999_vm3, %v4831_v41, %v3251_v37  ;;  %v4796_v37 = vld [vmem:[%s5997_s11 + $0x68] sm:$0x1]  ;;  %v4834_v27 = vrot.slane %v4794_v36, 9 }
  0xa4   : > { %v1014_v36 = vld [vmem:[%s5997_s11 + $0xbc] sm:$0x3] }
  0xa5   : > { %v1109_v52 = vsel %vm6204_vm6, %v4433_v50, %v1108_v40  ;;  %v1129_v40 = vrot.slane %v6258_v30, 6  ;;  %v6660_v30 = vld [vmem:[%s5997_s11 + $0x64] sm:$0xf] }
  0xa6   : > { %5191 = vmatmul.mubr.msk.bf16.vlgmr.msra.gmra.mrb[0].mxu1 %vm493_vm4, %v4443_v33  ;;  %v4784_v33 = vld [vmem:[%s5997_s11 + $0x38] sm:$0x1]  ;;  %v4450_v44 = vcombine.low %v1109_v52, %v1112_v18  ;;  %v1138_v52 = vrot.slane %v1136_v13, 4  ;;  %v1139_v18 = vrot.slane %v1008_v7, 6 }
  0xa7   : > { %5223 = vmatpush3.bf16.msra.mxu1 %v1620_v23  ;;  %5194 = vmatprep.mubr.msk.bf16.mxu1 %vm493_vm4, %v4444_v16  ;;  %v5781_v16 = vld [vmem:[%s5997_s11 + $0xcc] sm:$0xff]   ;;  %v1105_v23 = vsel %vm6204_vm6, %v1103_v2, %v1104_v5  ;;  %v3247_v32 = vrot.slane %v4784_v33, 5  ;;  %v6651_v5 = vld [vmem:[%s5997_s11 + $0x58] sm:$0xf]  ;;  %v1131_v48 = vrot.slane %v1129_v40, 4 }
  0xa8   : > { %5689 = vmatprep.subr.msk.bf16.mxu1 %vm542_vm0, %v5804_v42  ;;  %v4449_v38 = vcombine.low %v1102_v35, %v1105_v23  ;;  %v1117_v42 = vrot.slane %v1115_v24, 4  ;;  %v1006_v2 = vld [vmem:[%s5997_s11 + $0x8c] sm:$0x3]  ;;  %v4791_v23 = vld [vmem:[%s5997_s11 + $0x54] sm:$0xe]  ;;  %v3265_v24 = vrot.slane %v6651_v5, 5  ;;  %v1140_v41 = vsel %vm6204_vm6, %v1138_v52, %v1139_v18 }
  0xa9   : > { %5343 = vmatmul.mubr.msk.bf16.gmra.mrb[16].mxu0 %vm493_vm4, %v5777_v28  ;;  %v3246_v28 = vrot.slane %v3244_v9, 4  ;;  %v1132_v35 = vrot.slane %v1006_v2, 6  ;;  %v4797_v2 = vld [vmem:[%s5997_s11 + $0x6c] sm:$0xe] }
  0xaa   : > { %5346 = vmatprep.mubr.msk.bf16.mxu0 %vm493_vm4, %v5778_v43  ;;  %v1002_v43 = vld [vmem:[%s5997_s11 + $0x74] sm:$0x3]  ;;  %v3267_v51 = vrot.slane %v3265_v24, 4 }
  0xab   : > { %v1118_v62 = vrot.slane %v1002_v43, 6  ;;  %v3248_v61 = vsel %vm5999_vm3, %v3246_v28, %v3247_v32  ;;  %v4793_v32 = vld [vmem:[%s5997_s11 + $0x5c] sm:$0x1] }
  0xad   : > { %v1119_v57 = vsel %vm6204_vm6, %v1117_v42, %v1118_v62  ;;  %v1133_v62 = vsel %vm6204_vm6, %v1131_v48, %v1132_v35 }
  0xae   : > { %5195 = vmatmul.mubr.msk.bf16.gmra.mrb[4].mxu1 %vm493_vm4, %v4445_v60  ;;  %v4787_v60 = vld [vmem:[%s5997_s11 + $0x44] sm:$0x1]  ;;  %v4451_v15 = vcombine.low %v1116_v56, %v1119_v57  ;;  %v1012_v56 = vld [vmem:[%s5997_s11 + $0xb0] sm:$0x3]  ;;  %v6703_v57 = vld [vmem:[%s5997_s11 + $0x7c] sm:$0xf] }
  0xaf   : > { %5198 = vmatprep.mubr.msk.bf16.mxu1 %vm493_vm4, %v4446_v21  ;;  %v3245_v21 = vsel %vm5999_vm3, %v4830_v25, %v3244_v9  ;;  %v3254_v55 = vrot.slane %v4787_v60, 5  ;;  %v1007_v9 = vld [vmem:[%s5997_s11 + $0x90] sm:$0xc]  ;;  %v3268_v60 = vrot.slane %v4793_v32, 5  ;;  %v1157_v32 = vrot.slane %v6334_v1, 6 }
  0xb0   : > { %v4847_v17 = vcombine.low %v3245_v21, %v3248_v61  ;;  %v4437_v43 = vrot.slane %v1007_v9, 10  ;;  %v1010_v21 = vld [vmem:[%s5997_s11 + $0xa4] sm:$0x3]  ;;  %v3275_v61 = vrot.slane %v4796_v37, 5  ;;  %v6733_v37 = vld [vmem:[%s5997_s11 + $0x88] sm:$0xf] }
  0xb1   : > { %5347 = vmatmul.mubr.msk.bf16.gmra.mrb[20].mxu0 %vm493_vm4, %v5779_v47  ;;  %v1125_v47 = vrot.slane %v1004_v54, 6  ;;  %v3255_v33 = vsel %vm5999_vm3, %v3253_v4, %v3254_v55  ;;  %v1150_v4 = vrot.slane %v6319_v39, 6 }
  0xb2   : > { %5350 = vmatprep.mubr.msk.bf16.mxu0 %vm493_vm4, %v5780_v53  ;;  %v4790_v53 = vld [vmem:[%s5997_s11 + $0x50] sm:$0x1]  ;;  %v4848_v10 = vcombine.low %v3252_v0, %v3255_v33  ;;  %v3286_v0 = vrot.slane %v6703_v57, 5 }
  0xb3   : > { %v3261_v22 = vrot.slane %v4790_v53, 5  ;;  %v1126_v50 = vsel %vm6204_vm6, %v1124_v46, %v1125_v47  ;;  %v6689_v46 = vld [vmem:[%s5997_s11 + $0x70] sm:$0xf]  ;;  %v3923_v47 = vsel %vm542_vm0, %v6493_v12, 0  ;;  %v1137_v53 = vsel %vm6204_vm6, %v4437_v43, %v1136_v13 }
  0xb4   : > { %v3269_v12 = vsel %vm5999_vm3, %v3267_v51, %v3268_v60  ;;  %v3279_v39 = vrot.slane %v6689_v46, 5  ;;  %v1152_v9 = vrot.slane %v1150_v4, 4  ;;  %v1153_v13 = vrot.slane %v1012_v56, 6 }
  0xb5   : > { %v3288_v52 = vrot.slane %v3286_v0, 4  ;;  %v1159_v51 = vrot.slane %v1157_v32, 4  ;;  %v1160_v60 = vrot.slane %v1014_v36, 6 }
  0xb6   : > { %5199 = vmatmul.mubr.msk.bf16.gmra.mrb[8].mxu1 %vm493_vm4, %v4447_v14  ;;  %v3260_v14 = vrot.slane %v3258_v19, 4  ;;  %v3281_v48 = vrot.slane %v3279_v39, 4 }
  0xb7   : > { %5202 = vmatprep.mubr.msk.bf16.mxu1 %vm493_vm4, %v4448_v8  ;;  %v1123_v8 = vsel %vm6204_vm6, %v4435_v45, %v1122_v31  ;;  %v3272_v31 = vrot.slane %v6660_v30, 5  ;;  %v1143_v45 = vrot.slane %v6294_v11, 6  ;;  %v1011_v11 = vld [vmem:[%s5997_s11 + $0xa8] sm:$0xc] }
  0xb8   : > { %v4452_v25 = vcombine.low %v1123_v8, %v1126_v50  ;;  %v3262_v28 = vsel %vm5999_vm3, %v3260_v14, %v3261_v22  ;;  %v4799_v8 = vld [vmem:[%s5997_s11 + $0x74] sm:$0x1]  ;;  %v4439_v50 = vrot.slane %v1011_v11, 10  ;;  %v1161_v11 = vsel %vm6204_vm6, %v1159_v51, %v1160_v60  ;;  %v4817_v51 = vld [vmem:[%s5997_s11 + $0xbc] sm:$0x1] }
  0xb9   : > { %5351 = vmatmul.mubr.msk.bf16.gmra.mrb[24].mxu0 %vm493_vm4, %v5781_v16  ;;  %v4436_v16 = vrot.slane %v1005_v59, 10  ;;  %v1146_v59 = vrot.slane %v1010_v21, 6  ;;  %v1145_v22 = vrot.slane %v1143_v45, 4  ;;  %v3282_v35 = vrot.slane %v4799_v8, 5  ;;  %v5784_v8 = vld [vmem:[%s5997_s11 + $0x18] sm:$0xff]  }
  0xba   : > { %5354 = vmatprep.mubr.msk.bf16.mxu0 %vm493_vm4, %v5782_v20  ;;  %v3259_v20 = vsel %vm5999_vm3, %v4832_v58, %v3258_v19  ;;  %v3274_v19 = vrot.slane %v3272_v31, 4  ;;  %v1151_v43 = vsel %vm6204_vm6, %v4439_v50, %v1150_v4  ;;  %v3293_v21 = vrot.slane %v6733_v37, 5 }
  0xbb   : > { %v1130_v54 = vsel %vm6204_vm6, %v4436_v16, %v1129_v40  ;;  %v4849_v42 = vcombine.low %v3259_v20, %v3262_v28  ;;  %v4454_v40 = vcombine.low %v1137_v53, %v1140_v41  ;;  %v4802_v16 = vld [vmem:[%s5997_s11 + $0x80] sm:$0x1]  ;;  %v4835_v20 = vrot.slane %v4797_v2, 9  ;;  %v1013_v28 = vld [vmem:[%s5997_s11 + $0xb4] sm:$0xc] }
  0xbc   : > { %v4453_v55 = vcombine.low %v1130_v54, %v1133_v62  ;;  %v3276_v14 = vsel %vm5999_vm3, %v3274_v19, %v3275_v61  ;;  %v3289_v18 = vrot.slane %v4802_v16, 5  ;;  %v4805_v61 = vld [vmem:[%s5997_s11 + $0x8c] sm:$0x1]  ;;  %v4808_v53 = vld [vmem:[%s5997_s11 + $0x98] sm:$0x1]  ;;  %v3295_v56 = vrot.slane %v3293_v21, 4 }
  0xbd   : > { %v3280_v54 = vsel %vm5999_vm3, %v4835_v20, %v3279_v39  ;;  %v3303_v39 = vrot.slane %v4808_v53, 5  ;;  %v4812_v16 = vld [vmem:[%s5997_s11 + $0xa8] sm:$0xe] }
  0xbe   : > { %5203 = vmatmul.mubr.msk.bf16.gmra.mrb[12].mxu1 %vm493_vm4, %v4449_v38  ;;  %v4833_v38 = vrot.slane %v4791_v23, 9  ;;  %v3290_v19 = vsel %vm5999_vm3, %v3288_v52, %v3289_v18  ;;  %v5785_v52 = vld [vmem:[%s5997_s11 + $0x24] sm:$0xff]  }
  0xbf   : > { %5206 = vmatprep.mubr.msk.bf16.mxu1 %vm493_vm4, %v4450_v44  ;;  %v1009_v44 = vld [vmem:[%s5997_s11 + $0x9c] sm:$0xc] }
  0xc0   : > { %v4438_v58 = vrot.slane %v1009_v44, 10  ;;  %v4803_v44 = vld [vmem:[%s5997_s11 + $0x84] sm:$0xe] }
  0xc1   : > { %5355 = vmatmul.mubr.msk.bf16.gmra.mrb[28].mxu0 %vm493_vm4, %v5783_v49  ;;  %v3266_v49 = vsel %vm5999_vm3, %v4833_v38, %v3265_v24  ;;  %v1147_v24 = vsel %vm6204_vm6, %v1145_v22, %v1146_v59  ;;  %v3283_v38 = vsel %vm5999_vm3, %v3281_v48, %v3282_v35 }
  0xc2   : > { %5360 = vmatprep.mubr.msk.bf16.mxu0 %vm493_vm4, %v4847_v17  ;;  %v3273_v17 = vsel %vm5999_vm3, %v4834_v27, %v3272_v31  ;;  %v4850_v33 = vcombine.low %v3266_v49, %v3269_v12  ;;  %v1144_v7 = vsel %vm6204_vm6, %v4438_v58, %v1143_v45  ;;  %v1154_v31 = vsel %vm6204_vm6, %v1152_v9, %v1153_v13 }
  0xc3   : > { %v4851_v23 = vcombine.low %v3273_v17, %v3276_v14  ;;  %v4455_v1 = vcombine.low %v1144_v7, %v1147_v24  ;;  %v4456_v62 = vcombine.low %v1151_v43, %v1154_v31  ;;  %v4852_v41 = vcombine.low %v3280_v54, %v3283_v38  ;;  %v6764_v17 = vld [vmem:[%s5997_s11 + $0xac] sm:$0xf]  ;;  %v4814_v7 = vld [vmem:[%s5997_s11 + $0xb0] sm:$0x1]  ;;  %v6786_v43 = vld [vmem:[%s5997_s11 + $0xb8] sm:$0xf] }
  0xc4   : > { %v3296_v12 = vrot.slane %v4805_v61, 5  ;;  %v6789_v31 = vld [vmem:[%s5997_s11 + $0xc4] sm:$0xf]  ;;  %v3321_v54 = vrot.slane %v6786_v43, 5 }
  0xc5   : > { %v3328_v60 = vrot.slane %v6789_v31, 5 }
  0xc6   : > { %5207 = vmatmul.mubr.msk.bf16.gmra.mrb[16].mxu1 %vm493_vm4, %v4451_v15  ;;  %v4800_v15 = vld [vmem:[%s5997_s11 + $0x78] sm:$0xe]  ;;  %v3297_v2 = vsel %vm5999_vm3, %v3295_v56, %v3296_v12  ;;  %v5788_v12 = vld [vmem:[%s5997_s11 + $0x48] sm:$0xff]  }
  0xc7   : > { %5210 = vmatprep.mubr.msk.bf16.mxu1 %vm493_vm4, %v4452_v25  ;;  %v4836_v25 = vrot.slane %v4800_v15, 9  ;;  %v4809_v15 = vld [vmem:[%s5997_s11 + $0x9c] sm:$0xe] }
  0xc8   : > { %v4839_v35 = vrot.slane %v4809_v15, 9 }
  0xc9   : > { %5361 = vmatmul.mubr.msk.bf16.vlgmr.msra.gmra.mrb[0].mxu0 %vm493_vm4, %v4848_v10  ;;  %v6736_v10 = vld [vmem:[%s5997_s11 + $0x94] sm:$0xf]  ;;  %v3287_v27 = vsel %vm5999_vm3, %v4836_v25, %v3286_v0  ;;  %v4811_v0 = vld [vmem:[%s5997_s11 + $0xa4] sm:$0x1]  ;;  %v4840_v25 = vrot.slane %v4812_v16, 9 }
  0xca   : > { %5393 = vmatpush3.bf16.msra.mxu0 %v3923_v47  ;;  %5364 = vmatprep.mubr.msk.bf16.mxu0 %vm493_vm4, %v4849_v42  ;;  %v4440_v42 = vrot.slane %v1013_v28, 10  ;;  %v3300_v45 = vrot.slane %v6736_v10, 5  ;;  %v4806_v47 = vld [vmem:[%s5997_s11 + $0x90] sm:$0xe]  ;;  %v4853_v49 = vcombine.low %v3287_v27, %v3290_v19  ;;  %v3310_v24 = vrot.slane %v4811_v0, 5 }
  0xcb   : > { %v4838_v58 = vrot.slane %v4806_v47, 9  ;;  %v3324_v47 = vrot.slane %v4817_v51, 5 }
  0xcc   : > { %v1158_v4 = vsel %vm6204_vm6, %v4440_v42, %v1157_v32  ;;  %v3302_v59 = vrot.slane %v3300_v45, 4  ;;  %v3317_v32 = vrot.slane %v4814_v7, 5 }
  0xcd   : > { %v4457_v14 = vcombine.low %v1158_v4, %v1161_v11  ;;  %v3301_v9 = vsel %vm5999_vm3, %v4838_v58, %v3300_v45  ;;  %v3323_v45 = vrot.slane %v3321_v54, 4 }
  0xce   : > { %5211 = vmatmul.mubr.msk.bf16.gmra.mrb[20].mxu1 %vm493_vm4, %v4453_v55  ;;  %v4837_v55 = vrot.slane %v4803_v44, 9  ;;  %v3304_v13 = vsel %vm5999_vm3, %v3302_v59, %v3303_v39  ;;  %v4818_v44 = vld [vmem:[%s5997_s11 + $0xc0] sm:$0xe] }
  0xcf   : > { %5214 = vmatprep.mubr.msk.bf16.mxu1 %vm493_vm4, %v4454_v40  ;;  %v6761_v40 = vld [vmem:[%s5997_s11 + $0xa0] sm:$0xf]  ;;  %v4855_v48 = vcombine.low %v3301_v9, %v3304_v13  ;;  %v4842_v53 = vrot.slane %v4818_v44, 9  ;;  %v3325_v56 = vsel %vm5999_vm3, %v3323_v45, %v3324_v47  ;;  %v5792_v47 = vld [vmem:[%s5997_s11 + $0x78] sm:$0xff]  }
  0xd0   : > { %v3294_v22 = vsel %vm5999_vm3, %v4837_v55, %v3293_v21  ;;  %v3307_v50 = vrot.slane %v6761_v40, 5  ;;  %v4820_v21 = vld [vmem:[%s5997_s11 + $0xc8] sm:$0x1]  ;;  %v6813_v55 = vld [vmem:[%s5997_s11 + $0xd0] sm:$0xf] }
  0xd1   : > { %5365 = vmatmul.mubr.msk.bf16.gmra.mrb[4].mxu0 %vm493_vm4, %v4850_v33  ;;  %v3314_v33 = vrot.slane %v6764_v17, 5  ;;  %v4854_v20 = vcombine.low %v3294_v22, %v3297_v2  ;;  %v3331_v4 = vrot.slane %v4820_v21, 5  ;;  %v3335_v58 = vrot.slane %v6813_v55, 5  ;;  %v4823_v22 = vld [vmem:[%s5997_s11 + $0xd4] sm:$0x1] }
  0xd2   : > { %5368 = vmatprep.mubr.msk.bf16.mxu0 %vm493_vm4, %v4851_v23  ;;  %v3309_v23 = vrot.slane %v3307_v50, 4  ;;  %v3308_v18 = vsel %vm5999_vm3, %v4839_v35, %v3307_v50  ;;  %v3329_v59 = vsel %vm5999_vm3, %v4842_v53, %v3328_v60  ;;  %v4826_v50 = vld [vmem:[%s5997_s11 + $0xe0] sm:$0x1]  ;;  %v5789_v35 = vld [vmem:[%s5997_s11 + $0x54] sm:$0xff]   ;;  %v3721_v53 = vrot.slane %v6614_v29, 6 }
  0xd3   : > { %v3316_v28 = vrot.slane %v3314_v33, 4  ;;  %v3315_v38 = vsel %vm5999_vm3, %v4840_v25, %v3314_v33  ;;  %v3337_v0 = vrot.slane %v3335_v58, 4  ;;  %v3338_v33 = vrot.slane %v4823_v22, 5  ;;  %v5790_v25 = vld [vmem:[%s5997_s11 + $0x60] sm:$0xff]  }
  0xd4   : > { %v3311_v36 = vsel %vm5999_vm3, %v3309_v23, %v3310_v24 }
  0xd5   : > { %v3318_v42 = vsel %vm5999_vm3, %v3316_v28, %v3317_v32  ;;  %v4856_v27 = vcombine.low %v3308_v18, %v3311_v36  ;;  %v3339_v24 = vsel %vm5999_vm3, %v3337_v0, %v3338_v33  ;;  %v4827_v18 = vld [vmem:[%s5997_s11 + $0xe4] sm:$0xe]  ;;  %v4829_v36 = vld [vmem:[%s5997_s11 + $0xec] sm:$0x1]  ;;  %v3735_v0 = vrot.slane %v6651_v5, 6 }
  0xd6   : > { %5215 = vmatmul.mubr.msk.bf16.gmra.mrb[24].mxu1 %vm493_vm4, %v4455_v1  ;;  %v5786_v1 = vld [vmem:[%s5997_s11 + $0x30] sm:$0xff]   ;;  %v4857_v19 = vcombine.low %v3315_v38, %v3318_v42  ;;  %v4880_v38 = vld [vmem:[%s5997_s11 + $0x38] sm:$0x3]  ;;  %v4845_v51 = vrot.slane %v4827_v18, 9  ;;  %v3352_v44 = vrot.slane %v4829_v36, 5 }
  0xd7   : > { %5218 = vmatprep.mubr.msk.bf16.mxu1 %vm493_vm4, %v4456_v62  ;;  %v4815_v62 = vld [vmem:[%s5997_s11 + $0xb4] sm:$0xe] }
  0xd8   : > { %v4841_v61 = vrot.slane %v4815_v62, 9 }
  0xd9   : > { %5369 = vmatmul.mubr.msk.bf16.gmra.mrb[8].mxu0 %vm493_vm4, %v4852_v41  ;;  %v3330_v41 = vrot.slane %v3328_v60, 4 }
  0xda   : > { %5372 = vmatprep.mubr.msk.bf16.mxu0 %vm493_vm4, %v4853_v49  ;;  %v6816_v49 = vld [vmem:[%s5997_s11 + $0xdc] sm:$0xf]  ;;  %v3322_v11 = vsel %vm5999_vm3, %v4841_v61, %v3321_v54  ;;  %v4879_v54 = vld [vmem:[%s5997_s11 + $0x30] sm:$0xc] }
  0xdb   : > { %v3332_v39 = vsel %vm5999_vm3, %v3330_v41, %v3331_v4  ;;  %v3342_v2 = vrot.slane %v6816_v49, 5  ;;  %v4858_v9 = vcombine.low %v3322_v11, %v3325_v56  ;;  %v4911_v21 = vrot.slane %v4879_v54, 10  ;;  %v4882_v11 = vld [vmem:[%s5997_s11 + $0x44] sm:$0x3] }
  0xdc   : > { %v4859_v13 = vcombine.low %v3329_v59, %v3332_v39  ;;  %v3728_v56 = vrot.slane %v6624_v34, 6  ;;  %v3724_v22 = vrot.slane %v4882_v11, 6  ;;  %v5793_v34 = vld [vmem:[%s5997_s11 + $0x84] sm:$0xff]   ;;  %v5805_v11 = vld [vmem:[%s5997_s11 + $0x7c] sm:$0xf] }
  0xdd   : > { %v3344_v7 = vrot.slane %v3342_v2, 4 }
  0xde   : > { %5219 = vmatmul.mubr.msk.bf16.gmra.mrb[28].mxu1 %vm493_vm4, %v4457_v14  ;;  %v4821_v14 = vld [vmem:[%s5997_s11 + $0xcc] sm:$0xe] }
  0xdf   : > { %5224 = vmatprep.mubr.msk.bf16.mxu1 %vm493_vm4, %v5784_v8  ;;  %v4824_v8 = vld [vmem:[%s5997_s11 + $0xd8] sm:$0xe]  ;;  %v4843_v15 = vrot.slane %v4821_v14, 9  ;;  %v3723_v14 = vrot.slane %v3721_v53, 4 }
  0xe0   : > { %v4844_v16 = vrot.slane %v4824_v8, 9  ;;  %v3730_v8 = vrot.slane %v3728_v56, 4 }
  0xe1   : > { %5373 = vmatmul.mubr.msk.bf16.gmra.mrb[12].mxu0 %vm493_vm4, %v4854_v20  ;;  %v3345_v20 = vrot.slane %v4826_v50, 5  ;;  %v3336_v23 = vsel %vm5999_vm3, %v4843_v15, %v3335_v58  ;;  %v4884_v58 = vld [vmem:[%s5997_s11 + $0x50] sm:$0x3] }
  0xe2   : > { %5376 = vmatprep.mubr.msk.bf16.mxu0 %vm493_vm4, %v4855_v48  ;;  %v6839_v48 = vld [vmem:[%s5997_s11 + $0xe8] sm:$0xf]  ;;  %v3343_v32 = vsel %vm5999_vm3, %v4844_v16, %v3342_v2  ;;  %v4860_v42 = vcombine.low %v3336_v23, %v3339_v24  ;;  %v3731_v50 = vrot.slane %v4884_v58, 6  ;;  %v5794_v15 = vld [vmem:[%s5997_s11 + $0x90] sm:$0xff]   ;;  %v4887_v23 = vld [vmem:[%s5997_s11 + $0x60] sm:$0xc] }
  0xe3   : > { %v3349_v28 = vrot.slane %v6839_v48, 5  ;;  %v4888_v24 = vld [vmem:[%s5997_s11 + $0x68] sm:$0x3]  ;;  %v4915_v18 = vrot.slane %v4887_v23, 10 }
  0xe4   : > { %v3732_v16 = vsel %vm6204_vm6, %v3730_v8, %v3731_v50  ;;  %v6925_v58 = vld [vmem:[%s5997_s11 + $0x88] sm:$0xf]  ;;  %v5798_v8 = vld [vmem:[%s5997_s11 + $0xc0] sm:$0xff]  }
  0xe5   : > { %v3351_v60 = vrot.slane %v3349_v28, 4  ;;  %v3350_v61 = vsel %vm5999_vm3, %v4845_v51, %v3349_v28  ;;  %v3749_v51 = vrot.slane %v6689_v46, 6 }
  0xe6   : > { %5225 = vmatmul.mubr.msk.bf16.vlgmr.msra.gmra.mrb[0].mxu1 %vm493_vm4, %v5785_v52  ;;  %v3346_v52 = vsel %vm5999_vm3, %v3344_v7, %v3345_v20  ;;  %v4885_v7 = vld [vmem:[%s5997_s11 + $0x54] sm:$0xc]  ;;  %v4886_v20 = vld [vmem:[%s5997_s11 + $0x5c] sm:$0x3] }
  0xe7   : > { %5427 = vmatpush3.bf16.msra.mxu1 %v5981_v3  ;;  %5228 = vmatprep.mubr.msk.bf16.mxu1 %vm493_vm4, %v5786_v1  ;;  %v5787_v3 = vld [vmem:[%s5997_s11 + $0x3c] sm:$0xff]   ;;  %v3714_v1 = vrot.slane %v6596_v63, 6  ;;  %v4861_v62 = vcombine.low %v3343_v32, %v3346_v52  ;;  %v5791_v63 = vld [vmem:[%s5997_s11 + $0x6c] sm:$0xff]   ;;  %v3353_v45 = vsel %vm5999_vm3, %v3351_v60, %v3352_v44  ;;  %v4914_v28 = vrot.slane %v4885_v7, 10 }
  0xe8   : > { %v4862_v59 = vcombine.low %v3350_v61, %v3353_v45  ;;  %v3737_v32 = vrot.slane %v3735_v0, 4  ;;  %v3738_v52 = vrot.slane %v4886_v20, 6 }
  0xe9   : > { %5377 = vmatmul.mubr.msk.bf16.gmra.mrb[16].mxu0 %vm493_vm4, %v4856_v27  ;;  %v3716_v27 = vrot.slane %v3714_v1, 4  ;;  %v3715_v41 = vsel %vm6204_vm6, %v4911_v21, %v3714_v1  ;;  %v3745_v1 = vrot.slane %v4888_v24, 6  ;;  %v3736_v54 = vsel %vm6204_vm6, %v4914_v28, %v3735_v0  ;;  %v4890_v21 = vld [vmem:[%s5997_s11 + $0x74] sm:$0x3]  ;;  %v4566_v28 = vld [vmem:[%s5997_s11 + $0x84] sm:$0xe] }
  0xea   : > { %5380 = vmatprep.mubr.msk.bf16.mxu0 %vm493_vm4, %v4857_v19  ;;  %v3717_v19 = vrot.slane %v4880_v38, 6  ;;  %v3739_v38 = vsel %vm6204_vm6, %v3737_v32, %v3738_v52  ;;  %v4568_v32 = vld [vmem:[%s5997_s11 + $0x8c] sm:$0x1] }
  0xeb   : > { %v4931_v61 = vcombine.low %v3736_v54, %v3739_v38  ;;  %v4897_v38 = vld [vmem:[%s5997_s11 + $0x9c] sm:$0xc] }
  0xec   : > { %v3718_v4 = vsel %vm6204_vm6, %v3716_v27, %v3717_v19  ;;  %v4891_v27 = vld [vmem:[%s5997_s11 + $0x78] sm:$0xc]  ;;  %v3756_v19 = vrot.slane %v6703_v57, 6  ;;  %v1969_v57 = vrot.slane %v5805_v11, 5  ;;  %v4920_v11 = vrot.slane %v4897_v38, 10 }
  0xed   : > { %v4928_v29 = vcombine.low %v3715_v41, %v3718_v4  ;;  %v4917_v41 = vrot.slane %v4891_v27, 10  ;;  %v4898_v27 = vld [vmem:[%s5997_s11 + $0xa4] sm:$0x3] }
  0xee   : > { %5229 = vmatmul.mubr.msk.bf16.gmra.mrb[4].mxu1 %vm493_vm4, %v5787_v3  ;;  %v4881_v3 = vld [vmem:[%s5997_s11 + $0x3c] sm:$0xc]  ;;  %v3758_v4 = vrot.slane %v3756_v19, 4  ;;  %v1971_v0 = vrot.slane %v1969_v57, 4 }
  0xef   : > { %5232 = vmatprep.mubr.msk.bf16.mxu1 %vm493_vm4, %v5788_v12  ;;  %v4883_v12 = vld [vmem:[%s5997_s11 + $0x48] sm:$0xc]  ;;  %v4912_v39 = vrot.slane %v4881_v3, 10  ;;  %v3757_v50 = vsel %vm6204_vm6, %v4917_v41, %v3756_v19  ;;  %v3777_v19 = vrot.slane %v6761_v40, 6 }
  0xf0   : > { %v4913_v2 = vrot.slane %v4883_v12, 10  ;;  %v4565_v12 = vld [vmem:[%s5997_s11 + $0x80] sm:$0x1] }
  0xf1   : > { %5381 = vmatmul.mubr.msk.bf16.gmra.mrb[20].mxu0 %vm493_vm4, %v4858_v9  ;;  %v3722_v9 = vsel %vm6204_vm6, %v4912_v39, %v3721_v53  ;;  %v3752_v53 = vrot.slane %v4890_v21, 6  ;;  %v4893_v39 = vld [vmem:[%s5997_s11 + $0x84] sm:$0xc]  ;;  %v1979_v21 = vrot.slane %v4568_v32, 5  ;;  %v3798_v32 = vrot.slane %v6789_v31, 6 }
  0xf2   : > { %5384 = vmatprep.mubr.msk.bf16.mxu0 %vm493_vm4, %v4859_v13  ;;  %v3725_v13 = vsel %vm6204_vm6, %v3723_v14, %v3724_v22  ;;  %v3729_v33 = vsel %vm6204_vm6, %v4913_v2, %v3728_v56  ;;  %v4563_v56 = vld [vmem:[%s5997_s11 + $0x78] sm:$0xe]  ;;  %v3763_v14 = vrot.slane %v6733_v37, 6  ;;  %v4918_v7 = vrot.slane %v4893_v39, 10  ;;  %v5808_v39 = vld [vmem:[%s5997_s11 + $0xa0] sm:$0xf] }
  0xf3   : > { %v4930_v5 = vcombine.low %v3729_v33, %v3732_v16  ;;  %v1972_v33 = vrot.slane %v4565_v12, 5  ;;  %v4896_v16 = vld [vmem:[%s5997_s11 + $0x98] sm:$0x3] }
  0xf4   : > { %v3764_v54 = vsel %vm6204_vm6, %v4918_v7, %v3763_v14 }
  0xf6   : > { %5233 = vmatmul.mubr.msk.bf16.gmra.mrb[8].mxu1 %vm493_vm4, %v5789_v35  ;;  %v3742_v35 = vrot.slane %v6660_v30, 6  ;;  %v5795_v30 = vld [vmem:[%s5997_s11 + $0x9c] sm:$0xff]  }
  0xf7   : > { %5236 = vmatprep.mubr.msk.bf16.mxu1 %vm493_vm4, %v5790_v25  ;;  %v4929_v25 = vcombine.low %v3722_v9, %v3725_v13  ;;  %v4895_v9 = vld [vmem:[%s5997_s11 + $0x90] sm:$0xc]  ;;  %v3770_v13 = vrot.slane %v6736_v10, 6 }
  0xf8   : > { %v3744_v36 = vrot.slane %v3742_v35, 4  ;;  %v3743_v60 = vsel %vm6204_vm6, %v4915_v18, %v3742_v35  ;;  %v3765_v35 = vrot.slane %v3763_v14, 4  ;;  %v4919_v10 = vrot.slane %v4895_v9, 10  ;;  %v5809_v9 = vld [vmem:[%s5997_s11 + $0xac] sm:$0xf] }
  0xf9   : > { %5385 = vmatmul.mubr.msk.bf16.gmra.mrb[24].mxu0 %vm493_vm4, %v4860_v42  ;;  %v5796_v42 = vld [vmem:[%s5997_s11 + $0xa8] sm:$0xff]   ;;  %v1990_v14 = vrot.slane %v5808_v39, 5 }
  0xfa   : > { %5388 = vmatprep.mubr.msk.bf16.mxu0 %vm493_vm4, %v4861_v62  ;;  %v4889_v62 = vld [vmem:[%s5997_s11 + $0x6c] sm:$0xc]  ;;  %v3746_v44 = vsel %vm6204_vm6, %v3744_v36, %v3745_v1  ;;  %v1973_v36 = vsel %vm5999_vm3, %v1971_v0, %v1972_v33  ;;  %v5807_v1 = vld [vmem:[%s5997_s11 + $0x94] sm:$0xf]  ;;  %v4575_v33 = vld [vmem:[%s5997_s11 + $0xa8] sm:$0xe] }
  0xfb   : > { %v4916_v46 = vrot.slane %v4889_v62, 10  ;;  %v4932_v45 = vcombine.low %v3743_v60, %v3746_v44  ;;  %v4571_v62 = vld [vmem:[%s5997_s11 + $0x98] sm:$0x1]  ;;  %v4596_v44 = vrot.slane %v4566_v28, 9  ;;  %v4903_v28 = vld [vmem:[%s5997_s11 + $0xc0] sm:$0xc] }
  0xfc   : > { %v1986_v41 = vrot.slane %v4571_v62, 5 }
  0xfd   : > { %v3750_v22 = vsel %vm6204_vm6, %v4916_v46, %v3749_v51 }
  0xfe   : > { %5237 = vmatmul.mubr.msk.bf16.gmra.mrb[12].mxu1 %vm493_vm4, %v5791_v63  ;;  %v4892_v63 = vld [vmem:[%s5997_s11 + $0x80] sm:$0x3] }
  0xff   : > { %5240 = vmatprep.mubr.msk.bf16.mxu1 %vm493_vm4, %v5792_v47  ;;  %v3751_v47 = vrot.slane %v3749_v51, 4  ;;  %v3759_v3 = vrot.slane %v4892_v63, 6  ;;  %v5799_v51 = vld [vmem:[%s5997_s11 + $0xcc] sm:$0xff]  }
 0x101   : > { %5389 = vmatmul.mubr.msk.bf16.gmra.mrb[28].mxu0 %vm493_vm4, %v4862_v59  ;;  %v1976_v59 = vrot.slane %v6925_v58, 5  ;;  %v3753_v2 = vsel %vm6204_vm6, %v3751_v47, %v3752_v53  ;;  %v3760_v37 = vsel %vm6204_vm6, %v3758_v4, %v3759_v3  ;;  %v4900_v4 = vld [vmem:[%s5997_s11 + $0xb0] sm:$0x3]  ;;  %v3784_v3 = vrot.slane %v6764_v17, 6 }
 0x102   : > { %5394 = vmatprep.mubr.msk.bf16.mxu0 %vm493_vm4, %v4928_v29  ;;  %v5797_v29 = vld [vmem:[%s5997_s11 + $0xb4] sm:$0xff]   ;;  %v4933_v20 = vcombine.low %v3750_v22, %v3753_v2  ;;  %v4934_v24 = vcombine.low %v3757_v50, %v3760_v37  ;;  %v3779_v58 = vrot.slane %v3777_v19, 4  ;;  %v3787_v2 = vrot.slane %v4900_v4, 6 }
 0x103   : > { %v1978_v52 = vrot.slane %v1976_v59, 4 }
 0x105   : > { %v1980_v12 = vsel %vm5999_vm3, %v1978_v52, %v1979_v21 }
 0x106   : > { %5241 = vmatmul.mubr.msk.bf16.gmra.mrb[16].mxu1 %vm493_vm4, %v5793_v34  ;;  %v4894_v34 = vld [vmem:[%s5997_s11 + $0x8c] sm:$0x3] }
 0x107   : > { %5244 = vmatprep.mubr.msk.bf16.mxu1 %vm493_vm4, %v5794_v15  ;;  %v4595_v15 = vrot.slane %v4563_v56, 9  ;;  %v3766_v23 = vrot.slane %v4894_v34, 6  ;;  %v1977_v56 = vsel %vm5999_vm3, %v4596_v44, %v1976_v59  ;;  %v3786_v34 = vrot.slane %v3784_v3, 4 }
 0x108   : > { %v4613_v37 = vcombine.low %v1977_v56, %v1980_v12  ;;  %v3800_v44 = vrot.slane %v3798_v32, 4  ;;  %v3805_v12 = vrot.slane %v6813_v55, 6  ;;  %v4908_v55 = vld [vmem:[%s5997_s11 + $0xe0] sm:$0x3] }
 0x109   : > { %5395 = vmatmul.mubr.msk.bf16.vlgmr.msra.gmra.mrb[0].mxu0 %vm493_vm4, %v4929_v25  ;;  %v3772_v25 = vrot.slane %v3770_v13, 4  ;;  %v1970_v18 = vsel %vm5999_vm3, %v4595_v15, %v1969_v57  ;;  %v3767_v60 = vsel %vm6204_vm6, %v3765_v35, %v3766_v23  ;;  %v3780_v57 = vrot.slane %v4898_v27, 6  ;;  %v4901_v23 = vld [vmem:[%s5997_s11 + $0xb4] sm:$0xc] }
 0x10a   : > { %5398 = vmatprep.mubr.msk.bf16.mxu0 %vm493_vm4, %v4930_v5  ;;  %v3773_v5 = vrot.slane %v4896_v16, 6  ;;  %v4612_v63 = vcombine.low %v1970_v18, %v1973_v36  ;;  %v4935_v40 = vcombine.low %v3764_v54, %v3767_v60  ;;  %v3778_v15 = vsel %vm6204_vm6, %v4920_v11, %v3777_v19  ;;  %v4577_v16 = vld [vmem:[%s5997_s11 + $0xb0] sm:$0x1]  ;;  %v4578_v27 = vld [vmem:[%s5997_s11 + $0xb4] sm:$0xe] }
 0x10b   : > { %v3781_v7 = vsel %vm6204_vm6, %v3779_v58, %v3780_v57  ;;  %v3788_v52 = vsel %vm6204_vm6, %v3786_v34, %v3787_v2  ;;  %v4599_v18 = vrot.slane %v4575_v33, 9  ;;  %v4922_v38 = vrot.slane %v4901_v23, 10  ;;  %v5810_v19 = vld [vmem:[%s5997_s11 + $0xb8] sm:$0xf] }
 0x10c   : > { %v3774_v46 = vsel %vm6204_vm6, %v3772_v25, %v3773_v5  ;;  %v4902_v5 = vld [vmem:[%s5997_s11 + $0xbc] sm:$0x3]  ;;  %v4600_v56 = vrot.slane %v4578_v27, 9  ;;  %v3812_v34 = vrot.slane %v6816_v49, 6  ;;  %v5812_v49 = vld [vmem:[%s5997_s11 + $0xd0] sm:$0xf] }
 0x10d   : > { %v3794_v62 = vrot.slane %v4902_v5, 6  ;;  %v4586_v5 = vld [vmem:[%s5997_s11 + $0xd4] sm:$0x1] }
 0x10e   : > { %5245 = vmatmul.mubr.msk.bf16.gmra.mrb[20].mxu1 %vm493_vm4, %v5795_v30  ;;  %v1983_v30 = vrot.slane %v5807_v1, 5  ;;  %v2000_v1 = vrot.slane %v4577_v16, 5 }
 0x10f   : > { %5248 = vmatprep.mubr.msk.bf16.mxu1 %vm493_vm4, %v5796_v42  ;;  %v4569_v42 = vld [vmem:[%s5997_s11 + $0x90] sm:$0xe] }
 0x110   : > { %v4597_v47 = vrot.slane %v4569_v42, 9  ;;  %v1985_v53 = vrot.slane %v1983_v30, 4 }
 0x111   : > { %5399 = vmatmul.mubr.msk.bf16.gmra.mrb[4].mxu0 %vm493_vm4, %v4931_v61  ;;  %v3771_v61 = vsel %vm6204_vm6, %v4919_v10, %v3770_v13  ;;  %v1997_v13 = vrot.slane %v5809_v9, 5  ;;  %v3791_v10 = vrot.slane %v6786_v43, 6  ;;  %v4937_v43 = vcombine.low %v3778_v15, %v3781_v7 }
 0x112   : > { %5402 = vmatprep.mubr.msk.bf16.mxu0 %vm493_vm4, %v4932_v45  ;;  %v4899_v45 = vld [vmem:[%s5997_s11 + $0xa8] sm:$0xc]  ;;  %v4936_v17 = vcombine.low %v3771_v61, %v3774_v46  ;;  %v1984_v50 = vsel %vm5999_vm3, %v4597_v47, %v1983_v30  ;;  %v1987_v59 = vsel %vm5999_vm3, %v1985_v53, %v1986_v41  ;;  %v4904_v30 = vld [vmem:[%s5997_s11 + $0xc8] sm:$0x3]  ;;  %v5811_v47 = vld [vmem:[%s5997_s11 + $0xc4] sm:$0xf] }
 0x113   : > { %v4921_v22 = vrot.slane %v4899_v45, 10  ;;  %v1999_v36 = vrot.slane %v1997_v13, 4  ;;  %v3793_v42 = vrot.slane %v3791_v10, 4  ;;  %v3801_v21 = vrot.slane %v4904_v30, 6  ;;  %v4580_v45 = vld [vmem:[%s5997_s11 + $0xbc] sm:$0x1] }
 0x114   : > { %v1998_v61 = vsel %vm5999_vm3, %v4599_v18, %v1997_v13  ;;  %v2011_v53 = vrot.slane %v5811_v47, 5  ;;  %v3792_v4 = vsel %vm6204_vm6, %v4922_v38, %v3791_v10  ;;  %v3807_v15 = vrot.slane %v3805_v12, 4 }
 0x115   : > { %v3785_v25 = vsel %vm6204_vm6, %v4921_v22, %v3784_v3  ;;  %v2001_v46 = vsel %vm5999_vm3, %v1999_v36, %v2000_v1  ;;  %v4581_v3 = vld [vmem:[%s5997_s11 + $0xc0] sm:$0xe]  ;;  %v3795_v11 = vsel %vm6204_vm6, %v3793_v42, %v3794_v62  ;;  %v4906_v22 = vld [vmem:[%s5997_s11 + $0xd4] sm:$0x3]  ;;  %v2021_v30 = vrot.slane %v4586_v5, 5 }
 0x116   : > { %5249 = vmatmul.mubr.msk.bf16.gmra.mrb[24].mxu1 %vm493_vm4, %v5797_v29  ;;  %v4572_v29 = vld [vmem:[%s5997_s11 + $0x9c] sm:$0xe]  ;;  %v4938_v60 = vcombine.low %v3785_v25, %v3788_v52  ;;  %v4616_v58 = vcombine.low %v1998_v61, %v2001_v46  ;;  %v4601_v2 = vrot.slane %v4581_v3, 9  ;;  %v4939_v9 = vcombine.low %v3792_v4, %v3795_v11  ;;  %v4910_v42 = vld [vmem:[%s5997_s11 + $0xec] sm:$0x3] }
 0x117   : > { %5252 = vmatprep.mubr.msk.bf16.mxu1 %vm493_vm4, %v5798_v8  ;;  %v4574_v8 = vld [vmem:[%s5997_s11 + $0xa4] sm:$0x1]  ;;  %v4598_v0 = vrot.slane %v4572_v29, 9  ;;  %v3802_v29 = vsel %vm6204_vm6, %v3800_v44, %v3801_v21  ;;  %v3815_v25 = vrot.slane %v4908_v55, 6  ;;  %v3822_v27 = vrot.slane %v4910_v42, 6 }
 0x118   : > { %v1993_v35 = vrot.slane %v4574_v8, 5  ;;  %v2013_v8 = vrot.slane %v2011_v53, 4  ;;  %v2012_v23 = vsel %vm5999_vm3, %v4601_v2, %v2011_v53 }
 0x119   : > { %5403 = vmatmul.mubr.msk.bf16.gmra.mrb[8].mxu0 %vm493_vm4, %v4933_v20  ;;  %v1992_v20 = vrot.slane %v1990_v14, 4  ;;  %v1991_v54 = vsel %vm5999_vm3, %v4598_v0, %v1990_v14  ;;  %v2007_v14 = vrot.slane %v4580_v45, 5  ;;  %v3808_v0 = vrot.slane %v4906_v22, 6 }
 0x11a   : > { %5406 = vmatprep.mubr.msk.bf16.mxu0 %vm493_vm4, %v4934_v24  ;;  %v4614_v24 = vcombine.low %v1984_v50, %v1987_v59  ;;  %v4907_v59 = vld [vmem:[%s5997_s11 + $0xd8] sm:$0xc] }
 0x11b   : > { %v1994_v31 = vsel %vm5999_vm3, %v1992_v20, %v1993_v35  ;;  %v4925_v7 = vrot.slane %v4907_v59, 10  ;;  %v4584_v20 = vld [vmem:[%s5997_s11 + $0xcc] sm:$0xe]  ;;  %v2018_v35 = vrot.slane %v5812_v49, 5  ;;  %v3809_v52 = vsel %vm6204_vm6, %v3807_v15, %v3808_v0 }
 0x11c   : > { %v4615_v41 = vcombine.low %v1991_v54, %v1994_v31  ;;  %v4602_v18 = vrot.slane %v4584_v20, 9  ;;  %v3819_v54 = vrot.slane %v6839_v48, 6 }
 0x11d   : > { %v2020_v1 = vrot.slane %v2018_v35, 4  ;;  %v3813_v38 = vsel %vm6204_vm6, %v4925_v7, %v3812_v34 }
 0x11e   : > { %5253 = vmatmul.mubr.msk.bf16.gmra.mrb[28].mxu1 %vm493_vm4, %v5799_v51  ;;  %v4923_v51 = vrot.slane %v4903_v28, 10  ;;  %v3821_v21 = vrot.slane %v3819_v54, 4 }
 0x11f   : > { %5274 = vmatprep.mubr.msk.bf16.mxu1 %vm493_vm4, %v4612_v63  ;;  %v2004_v63 = vrot.slane %v5810_v19, 5  ;;  %v2022_v48 = vsel %vm5999_vm3, %v2020_v1, %v2021_v30 }
 0x120   : > { %v3799_v57 = vsel %vm6204_vm6, %v4923_v51, %v3798_v32  ;;  %v2019_v51 = vsel %vm5999_vm3, %v4602_v18, %v2018_v35  ;;  %v3823_v61 = vsel %vm6204_vm6, %v3821_v21, %v3822_v27 }
 0x121   : > { %5407 = vmatmul.mubr.msk.bf16.gmra.mrb[12].mxu0 %vm493_vm4, %v4935_v40  ;;  %v4583_v40 = vld [vmem:[%s5997_s11 + $0xc8] sm:$0x1]  ;;  %v2006_v39 = vrot.slane %v2004_v63, 4  ;;  %v2005_v13 = vsel %vm5999_vm3, %v4600_v56, %v2004_v63  ;;  %v4940_v33 = vcombine.low %v3799_v57, %v3802_v29  ;;  %v4619_v19 = vcombine.low %v2019_v51, %v2022_v48 }
 0x122   : > { %5410 = vmatprep.mubr.msk.bf16.mxu0 %vm493_vm4, %v4936_v17  ;;  %v4905_v17 = vld [vmem:[%s5997_s11 + $0xcc] sm:$0xc]  ;;  %v2014_v50 = vrot.slane %v4583_v40, 5 }
 0x123   : > { %v2008_v16 = vsel %vm5999_vm3, %v2006_v39, %v2007_v14 }
 0x124   : > { %v2015_v10 = vsel %vm5999_vm3, %v2013_v8, %v2014_v50  ;;  %v4617_v28 = vcombine.low %v2005_v13, %v2008_v16 }
 0x125   : > { %v4618_v36 = vcombine.low %v2012_v23, %v2015_v10 }
 0x126   : > { %5275 = vmatmul.mubr.msk.bf16.vlgmr.msra.gmra.mrb[16].mxu1 %vm493_vm4, %v4613_v37  ;;  %v4924_v37 = vrot.slane %v4905_v17, 10  ;;  %v7090_v17 = vld [vmem:[%s7223_s2] ss:$0 sm:$0xff] }
 0x127   : > { %5278 = vmatprep.mubr.msk.bf16.mxu1 %vm493_vm4, %v4614_v24  ;;  %v3814_v24 = vrot.slane %v3812_v34, 4 }
 0x128   : > { %v3806_v32 = vsel %vm6204_vm6, %v4924_v37, %v3805_v12 }
 0x129   : > { %5411 = vmatmul.mubr.msk.bf16.gmra.mrb[16].mxu0 %vm493_vm4, %v4937_v43  ;;  %v4909_v43 = vld [vmem:[%s5997_s11 + $0xe4] sm:$0xc]  ;;  %v3816_v31 = vsel %vm6204_vm6, %v3814_v24, %v3815_v25  ;;  %v4941_v62 = vcombine.low %v3806_v32, %v3809_v52  ;;  %s7098_s11 = scalar_lea.vmem [#allocation2], %s4342_s10 }
 0x12a   : > { %5414 = vmatprep.mubr.msk.bf16.mxu0 %vm493_vm4, %v4938_v60  ;;  %v4926_v60 = vrot.slane %v4909_v43, 10  ;;  %v4942_v44 = vcombine.low %v3813_v38, %v3816_v31  ;;  %s4236_s19 = sshll.u32 %s7098_s11, 4  ;;  %s7168_s19 = int_to_ptr.vmem [resolvable:$true] %s4236_s19 }
 0x12b   : > { %s5813_s27 = scalar_lea.vmem %s7168_s19, 4096  ;;  %p5820_p1 = scmp.lt.s32.totalorder %s7168_s19, %s5818_s29 }
 0x12c   : > { %v3820_v63 = vsel %vm6204_vm6, %v4926_v60, %v3819_v54  ;;  %p5814_p12 = scmp.ne.s32.totalorder %s7168_s19, %s5813_s27  ;;  %p5821_p2 = scmp.lt.s32.totalorder %s5819_s30, %s5813_s27 }
 0x12d   : > { %v4943_v46 = vcombine.low %v3820_v63, %v3823_v61 }
 0x12e   : > { %5279 = vmatmul.mubr.msk.bf16.gmra.mrb[20].mxu1 %vm493_vm4, %v4615_v41  ;;  %p5815_p13 = pnand %p5814_p12, %p5956_p4  ;;  %p5822_p3 = por %p5821_p2, %p5820_p1 }
 0x12f   : > { %5282 = vmatprep.mubr.msk.bf16.mxu1 %vm493_vm4, %v4616_v58 }
 0x130   : > { %p5816_p0 = pneg %p5815_p13 }
 0x131   : > { %5415 = vmatmul.mubr.msk.bf16.gmra.mrb[20].mxu0 %vm493_vm4, %v4939_v9 }
 0x132   : > { %5418 = vmatprep.mubr.msk.bf16.mxu0 %vm493_vm4, %v4940_v33  ;;  %p5823_p5 = pnand %p5822_p3, %p5816_p0 }
 0x136   : > { %5283 = vmatmul.mubr.msk.bf16.gmra.mrb[24].mxu1 %vm493_vm4, %v4617_v28 }
 0x137   : > { %5286 = vmatprep.mubr.msk.bf16.mxu1 %vm493_vm4, %v4618_v36 }
 0x139   : > { %5419 = vmatmul.mubr.msk.bf16.gmra.mrb[24].mxu0 %vm493_vm4, %v4941_v62 }
 0x13a   : > { %5422 = vmatprep.mubr.msk.bf16.mxu0 %vm493_vm4, %v4942_v44 }
 0x13e   : > { %5287 = vmatmul.mubr.msk.bf16.gmra.mrb[28].mxu1 %vm493_vm4, %v4619_v19 }
 0x141   : > { %5423 = vmatmul.mubr.msk.bf16.gmra.mrb[28].mxu0 %vm493_vm4, %v4943_v46 }
 0x1b9   : > { %v5226_v6 = vpop.f32.mrb[0].mxu1 }
 0x1ba   : > { %v1656_v45 = vpop.f32.mrb[1].mxu1 }
 0x1bb   : > { %v5227_v47 = vpop.f32.mrb[2].mxu1 }
 0x1bc   : > { %v1659_v53 = vpop.f32.mrb[3].mxu1 }
 0x1c1   : > { %v5230_v41 = vpop.f32.mrb[4].mxu1 }
 0x1c2   : > { %v1672_v4 = vpop.f32.mrb[5].mxu1 }
 0x1c3   : > { %v5231_v3 = vpop.f32.mrb[6].mxu1 }
 0x1c4   : > { %v1675_v40 = vpop.f32.mrb[7].mxu1 }
 0x1c9   : > { %v5234_v11 = vpop.f32.mrb[8].mxu1 }
 0x1ca   : > { %v1688_v57 = vpop.f32.mrb[9].mxu1 }
 0x1cb   : > { %v5235_v56 = vpop.f32.mrb[10].mxu1 }
 0x1cc   : > { %v1691_v26 = vpop.f32.mrb[11].mxu1 }
 0x1d1   : > { %v7078_v12 = vpop.f32.mrb[12].mxu1 }
 0x1d2   : > { %v7080_v58 = vpop.f32.mrb[13].mxu1 }
 0x1d3   : > { %v7082_v29 = vpop.f32.mrb[14].mxu1 }
 0x1d4   : > { %v7084_v39 = vpop.f32.mrb[15].mxu1 }
 0x1dc   : > { %v5396_v14 = vpop.f32.mrb[0].mxu0 }
 0x1dd   : > { %v5428_v22 = vadd.f32 %v5396_v14, %v5226_v6  ;;  %v3959_v2 = vpop.f32.mrb[1].mxu0 }
 0x1de   : > { %v5429_v8 = vadd.f32 %v3959_v2, %v1656_v45  ;;  %v5397_v50 = vpop.f32.mrb[2].mxu0 }
 0x1df   : > { %v4127_v59 = vadd.f32 %v5428_v22, %v7090_v17  ;;  %v5430_v34 = vadd.f32 %v5397_v50, %v5227_v47  ;;  %v3962_v9 = vpop.f32.mrb[3].mxu0 }
 0x1e0   : > { %v4125_v55 = vadd.f32 %v5429_v8, %v7090_v17  ;;  %v5431_v13 = vadd.f32 %v3962_v9, %v1659_v53 }
 0x1e1   : > { %v4159_v37 = vmax.f32 %v4127_v59, 0.0  ;;  %v4128_v15 = vadd.f32 %v5430_v34, %v7090_v17 }
 0x1e2   : > { %v4157_v0 = vmax.f32 %v4125_v55, 0.0  ;;  %v4126_v33 = vadd.f32 %v5431_v13, %v7090_v17 }
 0x1e3   : > { %4191 = vst [vmem:[%s7098_s11 + $0x10] sm:$0xff] %v4159_v37  ;;  %v4160_v16 = vmax.f32 %v4128_v15, 0.0 }
 0x1e4   : > { %4189 = vst [vmem:[%s7098_s11] sm:$0xff] %v4157_v0  ;;  %v4158_v7 = vmax.f32 %v4126_v33, 0.0  ;;  %v5400_v20 = vpop.f32.mrb[4].mxu0 }
 0x1e5   : > { %4192 = vst [vmem:[%s7098_s11 + $0x18] sm:$0xff] %v4160_v16  ;;  %v5432_v49 = vadd.f32 %v5400_v20, %v5230_v41  ;;  %v3975_v35 = vpop.f32.mrb[5].mxu0 }
 0x1e6   : > { %4190 = vst [vmem:[%s7098_s11 + $0x8] sm:$0xff] %v4158_v7  ;;  %v5433_v23 = vadd.f32 %v3975_v35, %v1672_v4  ;;  %v5401_v10 = vpop.f32.mrb[6].mxu0 }
 0x1e7   : > { %v4131_v24 = vadd.f32 %v5432_v49, %v7090_v17  ;;  %v5434_v25 = vadd.f32 %v5401_v10, %v5231_v3  ;;  %v3978_v5 = vpop.f32.mrb[7].mxu0 }
 0x1e8   : > { %v4129_v28 = vadd.f32 %v5433_v23, %v7090_v17  ;;  %v5435_v32 = vadd.f32 %v3978_v5, %v1675_v40 }
 0x1e9   : > { %v4163_v52 = vmax.f32 %v4131_v24, 0.0  ;;  %v4132_v18 = vadd.f32 %v5434_v25, %v7090_v17 }
 0x1ea   : > { %v4161_v36 = vmax.f32 %v4129_v28, 0.0  ;;  %v4130_v1 = vadd.f32 %v5435_v32, %v7090_v17 }
 0x1eb   : > { %4195 = vst [vmem:[%s7098_s11 + $0x30] sm:$0xff] %v4163_v52  ;;  %v4164_v30 = vmax.f32 %v4132_v18, 0.0 }
 0x1ec   : > { %4193 = vst [vmem:[%s7098_s11 + $0x20] sm:$0xff] %v4161_v36  ;;  %v4162_v43 = vmax.f32 %v4130_v1, 0.0  ;;  %v5404_v54 = vpop.f32.mrb[8].mxu0 }
 0x1ed   : > { %4196 = vst [vmem:[%s7098_s11 + $0x38] sm:$0xff] %v4164_v30  ;;  %v5436_v38 = vadd.f32 %v5404_v54, %v5234_v11  ;;  %v3991_v31 = vpop.f32.mrb[9].mxu0 }
 0x1ee   : > { %4194 = vst [vmem:[%s7098_s11 + $0x28] sm:$0xff] %v4162_v43  ;;  %v5437_v42 = vadd.f32 %v3991_v31, %v1688_v57  ;;  %v5405_v62 = vpop.f32.mrb[10].mxu0 }
 0x1ef   : > { %v4135_v51 = vadd.f32 %v5436_v38, %v7090_v17  ;;  %v5438_v60 = vadd.f32 %v5405_v62, %v5235_v56  ;;  %v3994_v44 = vpop.f32.mrb[11].mxu0 }
 0x1f0   : > { %v4133_v48 = vadd.f32 %v5437_v42, %v7090_v17  ;;  %v5439_v21 = vadd.f32 %v3994_v44, %v1691_v26 }
 0x1f1   : > { %v4167_v27 = vmax.f32 %v4135_v51, 0.0  ;;  %v4136_v19 = vadd.f32 %v5438_v60, %v7090_v17 }
 0x1f2   : > { %v4165_v63 = vmax.f32 %v4133_v48, 0.0  ;;  %v4134_v61 = vadd.f32 %v5439_v21, %v7090_v17 }
 0x1f3   : > { %4199 = vst [vmem:[%s7098_s11 + $0x50] sm:$0xff] %v4167_v27  ;;  %v4168_v46 = vmax.f32 %v4136_v19, 0.0 }
 0x1f4   : > { %4197 = vst [vmem:[%s7098_s11 + $0x40] sm:$0xff] %v4165_v63  ;;  %v4166_v6 = vmax.f32 %v4134_v61, 0.0  ;;  %v5408_v45 = vpop.f32.mrb[12].mxu0 }
 0x1f5   : > { %4200 = vst [vmem:[%s7098_s11 + $0x58] sm:$0xff] %v4168_v46  ;;  %v5440_v47 = vadd.f32 %v5408_v45, %v7078_v12  ;;  %v4007_v53 = vpop.f32.mrb[13].mxu0 }
 0x1f6   : > { %4198 = vst [vmem:[%s7098_s11 + $0x48] sm:$0xff] %v4166_v6  ;;  %v5441_v41 = vadd.f32 %v4007_v53, %v7080_v58  ;;  %v5409_v4 = vpop.f32.mrb[14].mxu0 }
 0x1f7   : > { %v4139_v3 = vadd.f32 %v5440_v47, %v7090_v17  ;;  %v5442_v40 = vadd.f32 %v5409_v4, %v7082_v29  ;;  %v4010_v11 = vpop.f32.mrb[15].mxu0 }
 0x1f8   : > { %v4137_v57 = vadd.f32 %v5441_v41, %v7090_v17  ;;  %v5443_v56 = vadd.f32 %v4010_v11, %v7084_v39 }
 0x1f9   : > { %v5276_v26 = vpop.f32.mrb[16].mxu1  ;;  %v4171_v12 = vmax.f32 %v4139_v3, 0.0  ;;  %v4140_v14 = vadd.f32 %v5442_v40, %v7090_v17 }
 0x1fa   : > { %v2222_v22 = vpop.f32.mrb[17].mxu1  ;;  %v4169_v2 = vmax.f32 %v4137_v57, 0.0  ;;  %v4138_v58 = vadd.f32 %v5443_v56, %v7090_v17 }
 0x1fb   : > { %v5277_v8 = vpop.f32.mrb[18].mxu1  ;;  %4203 = vst [vmem:[%s7098_s11 + $0x70] sm:$0xff] %v4171_v12  ;;  %v4172_v50 = vmax.f32 %v4140_v14, 0.0 }
 0x1fc   : > { %v2225_v59 = vpop.f32.mrb[19].mxu1  ;;  %4201 = vst [vmem:[%s7098_s11 + $0x60] sm:$0xff] %v4169_v2  ;;  %v4170_v29 = vmax.f32 %v4138_v58, 0.0  ;;  %v5412_v34 = vpop.f32.mrb[16].mxu0 }
 0x1fd   : > { %4204 = vst [vmem:[%s7098_s11 + $0x78] sm:$0xff] %v4172_v50  ;;  %v5444_v9 = vadd.f32 %v5412_v34, %v5276_v26  ;;  %v4023_v55 = vpop.f32.mrb[17].mxu0 }
 0x1fe   : > { %4202 = vst [vmem:[%s7098_s11 + $0x68] sm:$0xff] %v4170_v29  ;;  %v5445_v39 = vadd.f32 %v4023_v55, %v2222_v22  ;;  %v5413_v13 = vpop.f32.mrb[18].mxu0 }
 0x1ff   : > { %v4143_v37 = vadd.f32 %v5444_v9, %v7090_v17  ;;  %v5446_v15 = vadd.f32 %v5413_v13, %v5277_v8  ;;  %v4026_v0 = vpop.f32.mrb[19].mxu0 }
 0x200   : > { %v4141_v33 = vadd.f32 %v5445_v39, %v7090_v17  ;;  %v5447_v16 = vadd.f32 %v4026_v0, %v2225_v59 }
 0x201   : > { %v5280_v7 = vpop.f32.mrb[20].mxu1  ;;  %v4175_v20 = vmax.f32 %v4143_v37, 0.0  ;;  %v4144_v49 = vadd.f32 %v5446_v15, %v7090_v17 }
 0x202   : > { %v2238_v35 = vpop.f32.mrb[21].mxu1  ;;  %v4173_v23 = vmax.f32 %v4141_v33, 0.0  ;;  %v4142_v10 = vadd.f32 %v5447_v16, %v7090_v17 }
 0x203   : > { %v5281_v24 = vpop.f32.mrb[22].mxu1  ;;  %4207 = vst [vmem:[%s7098_s11 + $0x90] sm:$0xff] %v4175_v20  ;;  %v4176_v25 = vmax.f32 %v4144_v49, 0.0 }
 0x204   : > { %v2241_v5 = vpop.f32.mrb[23].mxu1  ;;  %4205 = vst [vmem:[%s7098_s11 + $0x80] sm:$0xff] %v4173_v23  ;;  %v4174_v28 = vmax.f32 %v4142_v10, 0.0  ;;  %v5416_v32 = vpop.f32.mrb[20].mxu0 }
 0x205   : > { %4208 = vst [vmem:[%s7098_s11 + $0x98] sm:$0xff] %v4176_v25  ;;  %v5448_v52 = vadd.f32 %v5416_v32, %v5280_v7  ;;  %v4039_v18 = vpop.f32.mrb[21].mxu0 }
 0x206   : > { %4206 = vst [vmem:[%s7098_s11 + $0x88] sm:$0xff] %v4174_v28  ;;  %v5449_v36 = vadd.f32 %v4039_v18, %v2238_v35  ;;  %v5417_v1 = vpop.f32.mrb[22].mxu0 }
 0x207   : > { %v4147_v30 = vadd.f32 %v5448_v52, %v7090_v17  ;;  %v5450_v43 = vadd.f32 %v5417_v1, %v5281_v24  ;;  %v4042_v54 = vpop.f32.mrb[23].mxu0 }
 0x208   : > { %v4145_v38 = vadd.f32 %v5449_v36, %v7090_v17  ;;  %v5451_v31 = vadd.f32 %v4042_v54, %v2241_v5 }
 0x209   : > { %v5284_v42 = vpop.f32.mrb[24].mxu1  ;;  %v4179_v62 = vmax.f32 %v4147_v30, 0.0  ;;  %v4148_v51 = vadd.f32 %v5450_v43, %v7090_v17 }
 0x20a   : > { %v2254_v60 = vpop.f32.mrb[25].mxu1  ;;  %v4177_v44 = vmax.f32 %v4145_v38, 0.0  ;;  %v4146_v48 = vadd.f32 %v5451_v31, %v7090_v17 }
 0x20b   : > { %v5285_v21 = vpop.f32.mrb[26].mxu1  ;;  %4211 = vst [vmem:[%s7098_s11 + $0xb0] sm:$0xff] %v4179_v62  ;;  %v4180_v27 = vmax.f32 %v4148_v51, 0.0 }
 0x20c   : > { %v2257_v19 = vpop.f32.mrb[27].mxu1  ;;  %4209 = vst [vmem:[%s7098_s11 + $0xa0] sm:$0xff] %v4177_v44  ;;  %v4178_v63 = vmax.f32 %v4146_v48, 0.0  ;;  %v5420_v61 = vpop.f32.mrb[24].mxu0 }
 0x20d   : > { %4212 = vst [vmem:[%s7098_s11 + $0xb8] sm:$0xff] %v4180_v27  ;;  %v5452_v46 = vadd.f32 %v5420_v61, %v5284_v42  ;;  %v4055_v6 = vpop.f32.mrb[25].mxu0 }
 0x20e   : > { %4210 = vst [vmem:[%s7098_s11 + $0xa8] sm:$0xff] %v4178_v63  ;;  %v5453_v45 = vadd.f32 %v4055_v6, %v2254_v60  ;;  %v5421_v47 = vpop.f32.mrb[26].mxu0 }
 0x20f   : > { %v4151_v53 = vadd.f32 %v5452_v46, %v7090_v17  ;;  %v5454_v41 = vadd.f32 %v5421_v47, %v5285_v21  ;;  %v4058_v4 = vpop.f32.mrb[27].mxu0 }
 0x210   : > { %v4149_v3 = vadd.f32 %v5453_v45, %v7090_v17  ;;  %v5455_v40 = vadd.f32 %v4058_v4, %v2257_v19 }
 0x211   : > { %v5288_v11 = vpop.f32.mrb[28].mxu1  ;;  %v4183_v57 = vmax.f32 %v4151_v53, 0.0  ;;  %v4152_v56 = vadd.f32 %v5454_v41, %v7090_v17 }
 0x212   : > { %v2270_v26 = vpop.f32.mrb[29].mxu1  ;;  %v4181_v12 = vmax.f32 %v4149_v3, 0.0  ;;  %v4150_v14 = vadd.f32 %v5455_v40, %v7090_v17 }
 0x213   : > { %v5289_v22 = vpop.f32.mrb[30].mxu1  ;;  %4215 = vst [vmem:[%s7098_s11 + $0xd0] sm:$0xff] %v4183_v57  ;;  %v4184_v2 = vmax.f32 %v4152_v56, 0.0 }
 0x214   : > { %v2273_v58 = vpop.f32.mrb[31].mxu1  ;;  %4213 = vst [vmem:[%s7098_s11 + $0xc0] sm:$0xff] %v4181_v12  ;;  %v4182_v8 = vmax.f32 %v4150_v14, 0.0  ;;  %v5424_v50 = vpop.f32.mrb[28].mxu0 }
 0x215   : > { %4216 = vst [vmem:[%s7098_s11 + $0xd8] sm:$0xff] %v4184_v2  ;;  %v5456_v59 = vadd.f32 %v5424_v50, %v5288_v11  ;;  %v4071_v29 = vpop.f32.mrb[29].mxu0 }
 0x216   : > { %4214 = vst [vmem:[%s7098_s11 + $0xc8] sm:$0xff] %v4182_v8  ;;  %v5457_v34 = vadd.f32 %v4071_v29, %v2270_v26  ;;  %v5425_v9 = vpop.f32.mrb[30].mxu0 }
 0x217   : > { %v4155_v55 = vadd.f32 %v5456_v59, %v7090_v17  ;;  %v5458_v39 = vadd.f32 %v5425_v9, %v5289_v22  ;;  %v4074_v13 = vpop.f32.mrb[31].mxu0 }
 0x218   : > { %v4153_v37 = vadd.f32 %v5457_v34, %v7090_v17  ;;  %v5459_v15 = vadd.f32 %v4074_v13, %v2273_v58 }
 0x219   : > { %v4187_v0 = vmax.f32 %v4155_v55, 0.0  ;;  %v4156_v33 = vadd.f32 %v5458_v39, %v7090_v17 }
 0x21a   : > { %v4185_v16 = vmax.f32 %v4153_v37, 0.0  ;;  %v4154_v7 = vadd.f32 %v5459_v15, %v7090_v17 }
 0x21b   : > { %4219 = vst [vmem:[%s7098_s11 + $0xf0] sm:$0xff] %v4187_v0  ;;  %v4188_v20 = vmax.f32 %v4156_v33, 0.0 }
 0x21c   : > { %4217 = vst [vmem:[%s7098_s11 + $0xe0] sm:$0xff] %v4185_v16  ;;  %v4186_v49 = vmax.f32 %v4154_v7, 0.0 }
 0x21d   : > { %4220 = vst [vmem:[%s7098_s11 + $0xf8] sm:$0xff] %v4188_v20 }
 0x21e   : > { %4218 = vst [vmem:[%s7098_s11 + $0xe8] sm:$0xff] %v4186_v49 }
 0x21f   : > { %5826 = shalt.err (!%p5823_p5)
}
 0x220   : > { %s5827_s4 = scalar_lea.hbm %s7166_s26, 4096  ;;  %s5831_s7 = scalar_lea.hbm %s7224_s3, 8192 }
 0x221   : > { %p5828_p6 = scmp.ne.s32.totalorder %s7166_s26, %s5827_s4  ;;  %p5832_p10 = scmp.lt.u32.totalorder %s7166_s26, %s7224_s3 }
 0x222   : > { %p5833_p11 = scmp.lt.u32.totalorder %s5831_s7, %s5827_s4  ;;  %p5835_p13 = scmp.lt.u32.totalorder %s5827_s4, %s7166_s26 }
 0x223   : > { %p5829_p7 = pnand %p5828_p6, %p5956_p4 }
 0x224   : > { %p5834_p12 = por %p5833_p11, %p5832_p10 }
 0x225   : > { %p5830_p9 = pneg %p5829_p7 }
 0x226   : > { %p5836_p0 = por %p5835_p13, %p5834_p12 }
 0x228   : > { %p5837_p1 = pnand %p5836_p0, %p5830_p9 }
 0x22a   : > { %5840 = shalt.err (!%p5837_p1)
}
 0x22b   : > { %s5894_s10 = smov 128   ;;  %s5895_s11 = smov 8  }
 0x22c   : > { %5695 = dma.vmem_to_hbm [thread:$0]  (%p5956_p4), %s7168_s19, 4096, %s7166_s26, %s7175_s15, %s5894_s10, %s5894_s10, %s5895_s11  }
 0x22d PF: > { %p5701_p2 = scmp.ge.s32.totalorder %s5891_s17, 2  ;;  %s4251_s18 = sand.u32 1, %s5871_s12  }
 0x22e   : > { %s4252_s21 = scalar_lea.sflag [#allocation3], %s4251_s18 }
 0x22f   : > { %p5698_p3 = pnand %p5701_p2, %p5963_p8 }
 0x231   : > { %5866 = dma.done.wait (!%p5698_p3), %s4252_s21, 4096  }
 0x232   : > { %5868 = vsyncadd (!%p5698_p3), %s4252_s21, 4294963200  ;;  %s16_s17 = sadd.s32 1, %s5891_s17   ;;  %s7231_s12 = smov %s5875_s13 }
 0x233   : > { %p13_p5 = scmp.ge.s32.totalorder %s16_s17, 4   ;;  %s7232_s13 = smov %s5879_s14 }
 0x234   : > { %s7233_s14 = smov %s5969_s25  ;;  %s7234_s15 = smov %s5887_s16 }
 0x235   : > { %s7235_s16 = smov %s7237_s20  ;;  %15 = sbr.rel (!%p13_p5) target bundleno = 4 (0x4), region = 83 }
 0x23c   :  { %4257 = vsyncpa [#allocation3], 1 }
 0x23d   :  { %4259 = vsyncpa [#allocation3 + $0x1], 1 }

</bundles_post_ra>
